<compile_context>
chip_gen: v5e
topology: v5e:2x2
jax: 0.10.0
libtpu: 0.0.40
codegen_flags: <defaults>
</compile_context>

<pallas_src>
import functools
import math

import jax
import jax.numpy as jnp
from jax.experimental import pallas as pl
from jax.experimental.pallas import tpu as pltpu


# ----------------------------------------------------------------------------- fused kernel

def _posterior_encoder_kernel(
        lens_ref, starts_ref,                                    # scalar-prefetch (SMEM)
        x_ref, pre_w_ref, pre_b_ref,
        cond_t_ref, cond_s_ref,
        in_w_t_ref, in_w_s_ref,
        rs_res_w_ref, rs_res_b_ref, rs_skip_w_ref, rs_skip_b_ref,
        proj_wm_ref, proj_wl_ref, proj_bm_ref, proj_bl_ref,
        noise_ref,
        z_ref, m_ref, logs_ref,
        xpad_sc, skip_sc,
        *, T, H, Co, K, n_layers, max_pad, tau):
    b = pl.program_id(0)
    l = pl.program_id(1)
    length = lens_ref[b]
    # sequence mask built in-registers from the prefetched lengths (no HBM mask array)
    mask = (jax.lax.broadcasted_iota(jnp.int32, (T, 1), 0) < length).astype(jnp.float32)

    # ---- layer 0: pre 1x1 conv + scratch init --------------------------------------------
    @pl.when(l == 0)
    def _init():
        # zero only the halo rows (never written afterwards); done per batch step so the
        # kernel stays correct when the batch axis is split across TensorCores.
        if max_pad > 0:
            zhalo = jnp.zeros((max_pad, H), jnp.float32)
            xpad_sc[pl.ds(0, max_pad), :] = zhalo
            xpad_sc[pl.ds(max_pad + T, max_pad), :] = zhalo
        h0 = jnp.dot(x_ref[0], pre_w_ref[...], preferred_element_type=jnp.float32)   # (T, H)
        xpad_sc[pl.ds(max_pad, T), :] = (h0 + pre_b_ref[...]) * mask
        skip_sc[...] = jnp.zeros_like(skip_sc)

    # ---- one WN layer per grid step along the (arbitrary) layer axis ----------------------
    h_cur = xpad_sc[pl.ds(max_pad, T), :]                  # (T, H) f32 — also the center tap
    jc = (K - 1) // 2

    def tap(j):
        if (K % 2 == 1) and j == jc:
            return h_cur.astype(jnp.bfloat16)              # reuse the already-loaded center tap
        return xpad_sc[pl.ds(starts_ref[l, j], T), :].astype(jnp.bfloat16)

    # K accumulating MXU dots (no (T, K*H) concatenate / lane relayout); tanh and sigmoid
    # halves use separate host-split weights so there is no misaligned column slice.
    t0 = tap(0)
    acc_t = jnp.dot(t0, in_w_t_ref[0, 0], preferred_element_type=jnp.float32)
    acc_s = jnp.dot(t0, in_w_s_ref[0, 0], preferred_element_type=jnp.float32)
    for j in range(1, K):
        tj = tap(j)
        acc_t = acc_t + jnp.dot(tj, in_w_t_ref[0, j], preferred_element_type=jnp.float32)
        acc_s = acc_s + jnp.dot(tj, in_w_s_ref[0, j], preferred_element_type=jnp.float32)
    acc_t = acc_t + cond_t_ref[0, 0]                       # conditioning (+ in_layer bias, folded)
    acc_s = acc_s + cond_s_ref[0, 0]
    acts = (jnp.tanh(acc_t) * jax.nn.sigmoid(acc_s)).astype(jnp.bfloat16)   # (T, H)

    # skip half (all layers) — accumulated unmasked, like PyTorch WN
    skip = jnp.dot(acts, rs_skip_w_ref[0], preferred_element_type=jnp.float32) + rs_skip_b_ref[0]
    skip_sc[...] = skip_sc[...] + skip

    # residual half (all but the last layer)
    @pl.when(l < n_layers - 1)
    def _residual():
        res = jnp.dot(acts, rs_res_w_ref[0], preferred_element_type=jnp.float32) + rs_res_b_ref[0]
        xpad_sc[pl.ds(max_pad, T), :] = (h_cur + res) * mask

    # ---- last layer: proj 1x1 conv + reparameterization, three lane-dense outputs ---------
    @pl.when(l == n_layers - 1)
    def _epilogue():
        enc = (skip_sc[...] * mask).astype(jnp.bfloat16)   # WN returns output * x_mask
        m = jnp.dot(enc, proj_wm_ref[...], preferred_element_type=jnp.float32) + proj_bm_ref[...]
        lg = jnp.dot(enc, proj_wl_ref[...], preferred_element_type=jnp.float32) + proj_bl_ref[...]
        m = m * mask
        lg = lg * mask
        z = (m + noise_ref[0] * tau * jnp.exp(lg)) * mask
        z_ref[0] = z.astype(z_ref.dtype)
        m_ref[0] = m.astype(m_ref.dtype)
        logs_ref[0] = lg.astype(logs_ref.dtype)


def _nbytes(shape, dtype):
    return math.prod(shape) * jnp.dtype(dtype).itemsize


# ----------------------------------------------------------------------------- module

class PosteriorEncoderPallas:
    """JAX/Pallas port of PosteriorEncoder (pre -> WN -> proj -> reparam), fully fused."""

    def __init__(self, in_channels, out_channels, hidden_channels, kernel_size,
                 dilation_rate, n_layers, gin_channels=0, key=None):
        self.in_channels = in_channels
        self.out_channels = out_channels
        self.hidden_channels = hidden_channels
        self.kernel_size = kernel_size
        self.dilation_rate = dilation_rate
        self.n_layers = n_layers
        self.gin_channels = gin_channels

        key = key if key is not None else jax.random.PRNGKey(0)
        H, K, L, Co = hidden_channels, kernel_size, n_layers, out_channels
        keys = list(jax.random.split(key, 4 * n_layers + 8))
        ki = iter(keys)

        def init(shape, fan_in):
            return jax.random.normal(next(ki), shape, jnp.float32) / jnp.sqrt(fan_in)

        bf16 = jnp.bfloat16

        # pre: Conv1d(Cin, H, 1) as (Cin, H) for x @ w   (weight_norm assumed folded offline)
        self.pre_w = init((in_channels, H), in_channels).astype(bf16)
        self.pre_b = init((1, H), in_channels)

        # WN in_layers: Conv1d(H, 2H, K, dilation=d).  Kept as per-layer, per-tap (H, H) blocks,
        # pre-split into the tanh half and the sigmoid half so the kernel never slices columns.
        # (if loading torch weights w of shape (2H, H, K): w.permute(2, 1, 0) -> (K, H, 2H))
        in_w = jnp.stack([init((K, H, 2 * H), H * K) for _ in range(L)])        # (L, K, H, 2H)
        self.in_w_t = in_w[..., :H].astype(bf16)                                # (L, K, H, H)
        self.in_w_s = in_w[..., H:].astype(bf16)                                # (L, K, H, H)
        self.in_b = jnp.stack([init((2 * H,), H * K) for _ in range(L)])        # (L, 2H), folded into cond

        # res_skip: layers 0..L-2 are Conv1d(H, 2H, 1) ([:H] residual, [H:] skip);
        # last layer is Conv1d(H, H, 1) (skip only; its residual half is zero and never used).
        rs_res_w, rs_res_b, rs_skip_w, rs_skip_b = [], [], [], []
        for i in range(L):
            if i < L - 1:
                w = init((H, 2 * H), H)
                bi = init((2 * H,), H)
                rs_res_w.append(w[:, :H]);  rs_res_b.append(bi[:H])
                rs_skip_w.append(w[:, H:]); rs_skip_b.append(bi[H:])
            else:
                w = init((H, H), H)
                bi = init((H,), H)
                rs_res_w.append(jnp.zeros((H, H), jnp.float32))
                rs_res_b.append(jnp.zeros((H,), jnp.float32))
                rs_skip_w.append(w); rs_skip_b.append(bi)
        self.rs_res_w = jnp.stack(rs_res_w).astype(bf16)            # (L, H, H)
        self.rs_res_b = jnp.stack(rs_res_b).reshape(L, 1, H)        # (L, 1, H)
        self.rs_skip_w = jnp.stack(rs_skip_w).astype(bf16)          # (L, H, H)
        self.rs_skip_b = jnp.stack(rs_skip_b).reshape(L, 1, H)      # (L, 1, H)

        # cond layer: Conv1d(gin, 2H*L, 1)  (tiny -> applied on the host)
        if gin_channels != 0:
            self.cond_w = init((gin_channels, 2 * H * L), gin_channels)
            self.cond_b = init((1, 2 * H * L), gin_channels)

        # proj: Conv1d(H, 2*Co, 1), pre-split into the m half and the logs half
        proj_w = init((H, 2 * Co), H)
        proj_b = init((2 * Co,), H)
        self.proj_wm = proj_w[:, :Co].astype(bf16)
        self.proj_wl = proj_w[:, Co:].astype(bf16)
        self.proj_bm = proj_b[:Co].reshape(1, Co)
        self.proj_bl = proj_b[Co:].reshape(1, Co)

    def __call__(self, x, x_lengths, g=None, tau=1.0, noise_key=None):
        """x: (B, in_channels, T) [PyTorch NCL], x_lengths: (B,), g: (B, gin, 1) or None."""
        B, Cin, T = x.shape
        H, Co, K, L = self.hidden_channels, self.out_channels, self.kernel_size, self.n_layers
        dtype = x.dtype
        x_lengths = x_lengths.astype(jnp.int32)

        # --- host-side glue (all tiny relative to the fused kernel) ---
        # NCL -> NTC of the thin input; streamed bf16 (it is a bf16 matmul operand anyway).
        x_btc = jnp.transpose(x, (0, 2, 1)).astype(jnp.bfloat16)          # (B, T, Cin)

        if g is not None and self.gin_channels != 0:
            g2 = g[:, :, 0].astype(jnp.float32)                           # (B, gin)
            cond = jnp.dot(g2, self.cond_w) + self.cond_b                 # (B, 2H*L)
        else:
            cond = jnp.zeros((B, 2 * H * L), jnp.float32)
        # fold the in_layer bias into the conditioning vector; split tanh / sigmoid halves
        cond = cond.reshape(B, L, 2 * H) + self.in_b[None]                # (B, L, 2H)
        cond_t = cond[..., :H].reshape(B, L, 1, H)
        cond_s = cond[..., H:].reshape(B, L, 1, H)

        noise_key = noise_key if noise_key is not None else jax.random.PRNGKey(42)
        noise = jax.random.normal(noise_key, (B, T, Co), jnp.float32)     # randn_like(m)

        max_dil = self.dilation_rate ** (L - 1)
        max_pad = (K - 1) * max_dil // 2
        Tpad = T + 2 * max_pad

        # per-layer dilated-tap start offsets inside the padded scratch (scalar-prefetched to SMEM)
        starts = []
        for i in range(L):
            dil = self.dilation_rate ** i
            pad = (K - 1) * dil // 2
            starts.append([max_pad - pad + j * dil for j in range(K)])
        starts = jnp.asarray(starts, jnp.int32)                           # (L, K)

        kern = functools.partial(
            _posterior_encoder_kernel,
            T=T, H=H, Co=Co, K=K, n_layers=L, max_pad=max_pad, tau=float(tau))

        # --- VMEM budget: double-buffered blocks (counted once) + persistent scratch + margin,
        #     clamped to ~85% of the real device capacity (v7x: 64 MiB / TensorCore). ---
        blocks = [
            ((1, T, Cin), jnp.bfloat16), ((Cin, H), jnp.bfloat16), ((1, H), jnp.float32),
            ((1, 1, 1, H), jnp.float32), ((1, 1, 1, H), jnp.float32),
            ((1, K, H, H), jnp.bfloat16), ((1, K, H, H), jnp.bfloat16),
            ((1, H, H), jnp.bfloat16), ((1, 1, H), jnp.float32),
            ((1, H, H), jnp.bfloat16), ((1, 1, H), jnp.float32),
            ((H, Co), jnp.bfloat16), ((H, Co), jnp.bfloat16),
            ((1, Co), jnp.float32), ((1, Co), jnp.float32),
            ((1, T, Co), jnp.float32),
            ((1, T, Co), jnp.float32), ((1, T, Co), jnp.float32), ((1, T, Co), jnp.float32),
        ]
        vmem_needed = 2 * sum(_nbytes(s, d) for s, d in blocks)            # 2x default double-buffering
        vmem_needed += _nbytes((Tpad, H), jnp.float32) + _nbytes((T, H), jnp.float32)
        vmem_needed += 4 << 20                                             # Mosaic internal scratch margin
        cap = 64 << 20
        try:
            info_fn = getattr(pltpu, "get_tpu_info", None)
            if info_fn is not None:
                cap = int(getattr(info_fn(), "vmem_capacity_bytes", cap))
        except Exception:
            pass
        vmem_limit = int(min(int(cap * 0.85), max(vmem_needed, 16 << 20)))

        grid_spec = pltpu.PrefetchScalarGridSpec(
            num_scalar_prefetch=2,                 # x_lengths + per-layer tap offsets -> SMEM
            grid=(B, L),                           # batch (parallel) x WN layer (arbitrary, streamed)
            in_specs=[
                pl.BlockSpec((1, T, Cin), lambda b, l, *_: (b, 0, 0)),        # x (NTC, bf16)
                pl.BlockSpec((Cin, H), lambda b, l, *_: (0, 0)),              # pre_w
                pl.BlockSpec((1, H), lambda b, l, *_: (0, 0)),                # pre_b
                pl.BlockSpec((1, 1, 1, H), lambda b, l, *_: (b, l, 0, 0)),    # cond tanh half
                pl.BlockSpec((1, 1, 1, H), lambda b, l, *_: (b, l, 0, 0)),    # cond sigmoid half
                pl.BlockSpec((1, K, H, H), lambda b, l, *_: (l, 0, 0, 0)),    # in_w tanh half (streamed)
                pl.BlockSpec((1, K, H, H), lambda b, l, *_: (l, 0, 0, 0)),    # in_w sigmoid half (streamed)
                pl.BlockSpec((1, H, H), lambda b, l, *_: (l, 0, 0)),          # res_skip residual w
                pl.BlockSpec((1, 1, H), lambda b, l, *_: (l, 0, 0)),          # res_skip residual b
                pl.BlockSpec((1, H, H), lambda b, l, *_: (l, 0, 0)),          # res_skip skip w
                pl.BlockSpec((1, 1, H), lambda b, l, *_: (l, 0, 0)),          # res_skip skip b
                pl.BlockSpec((H, Co), lambda b, l, *_: (0, 0)),               # proj_w (m half)
                pl.BlockSpec((H, Co), lambda b, l, *_: (0, 0)),               # proj_w (logs half)
                pl.BlockSpec((1, Co), lambda b, l, *_: (0, 0)),               # proj_b (m)
                pl.BlockSpec((1, Co), lambda b, l, *_: (0, 0)),               # proj_b (logs)
                pl.BlockSpec((1, T, Co), lambda b, l, *_: (b, 0, 0)),         # noise
            ],
            out_specs=[
                pl.BlockSpec((1, T, Co), lambda b, l, *_: (b, 0, 0)),         # z
                pl.BlockSpec((1, T, Co), lambda b, l, *_: (b, 0, 0)),         # m
                pl.BlockSpec((1, T, Co), lambda b, l, *_: (b, 0, 0)),         # logs
            ],
            scratch_shapes=[
                pltpu.VMEM((Tpad, H), jnp.float32),   # padded activation (halo = conv zero pad)
                pltpu.VMEM((T, H), jnp.float32),      # skip accumulator
            ],
        )

        z, m, logs = pl.pallas_call(
            kern,
            out_shape=(jax.ShapeDtypeStruct((B, T, Co), jnp.float32),
                       jax.ShapeDtypeStruct((B, T, Co), jnp.float32),
                       jax.ShapeDtypeStruct((B, T, Co), jnp.float32)),
            grid_spec=grid_spec,
            compiler_params=pltpu.CompilerParams(
                dimension_semantics=("parallel", "arbitrary"),
                vmem_limit_bytes=vmem_limit),
        )(x_lengths, starts, x_btc, self.pre_w, self.pre_b, cond_t, cond_s,
          self.in_w_t, self.in_w_s, self.rs_res_w, self.rs_res_b,
          self.rs_skip_w, self.rs_skip_b,
          self.proj_wm, self.proj_wl, self.proj_bm, self.proj_bl, noise)

        # back to PyTorch NCL layout (tiny transposes)
        z = jnp.transpose(z, (0, 2, 1)).astype(dtype)
        m = jnp.transpose(m, (0, 2, 1)).astype(dtype)
        logs = jnp.transpose(logs, (0, 2, 1)).astype(dtype)
        mask_bt = (jnp.arange(T)[None, :] < x_lengths[:, None]).astype(dtype)
        x_mask = mask_bt[:, None, :]                                      # (B, 1, T)
        return z, m, logs, x_mask


# ----------------------------------------------------------------------------- main

if __name__ == "__main__":
    key = jax.random.PRNGKey(0)
    k_param, k_x, k_g, k_noise = jax.random.split(key, 4)

    B, Cin, T = 2, 6, 16
    Co, H, K, dil_rate, n_layers, gin = 4, 32, 5, 2, 3, 8

    enc = PosteriorEncoderPallas(Cin, Co, H, K, dil_rate, n_layers,
                                 gin_channels=gin, key=k_param)

    x = jax.random.normal(k_x, (B, Cin, T), jnp.float32)
    x_lengths = jnp.array([T, 11], jnp.int32)
    g = jax.random.normal(k_g, (B, gin, 1), jnp.float32)

    z, m, logs, x_mask = enc(x, x_lengths, g=g, tau=0.5, noise_key=k_noise)
    jax.block_until_ready((z, m, logs, x_mask))

    assert z.shape == (B, Co, T) and m.shape == (B, Co, T)
    assert logs.shape == (B, Co, T) and x_mask.shape == (B, 1, T)
    assert bool(jnp.all(jnp.isfinite(z)))
    assert bool(jnp.all(jnp.isfinite(m))) and bool(jnp.all(jnp.isfinite(logs)))
    print("KERNEL_OK")
</pallas_src>

<mosaic_0001>
module attributes {stable_mosaic.version = 11 : i64} {
  func.func @_posterior_encoder_kernel(%arg0: i32, %arg1: i32, %arg2: memref<2xi32, #tpu.memory_space<smem>>, %arg3: memref<3x5xi32, #tpu.memory_space<smem>>, %arg4: memref<1x16x6xbf16, #tpu.memory_space<vmem>>, %arg5: memref<6x32xbf16, #tpu.memory_space<vmem>>, %arg6: memref<1x32xf32, #tpu.memory_space<vmem>>, %arg7: memref<1x1x1x32xf32, #tpu.memory_space<vmem>>, %arg8: memref<1x1x1x32xf32, #tpu.memory_space<vmem>>, %arg9: memref<1x5x32x32xbf16, #tpu.memory_space<vmem>>, %arg10: memref<1x5x32x32xbf16, #tpu.memory_space<vmem>>, %arg11: memref<1x32x32xbf16, #tpu.memory_space<vmem>>, %arg12: memref<1x1x32xf32, #tpu.memory_space<vmem>>, %arg13: memref<1x32x32xbf16, #tpu.memory_space<vmem>>, %arg14: memref<1x1x32xf32, #tpu.memory_space<vmem>>, %arg15: memref<32x4xbf16, #tpu.memory_space<vmem>>, %arg16: memref<32x4xbf16, #tpu.memory_space<vmem>>, %arg17: memref<1x4xf32, #tpu.memory_space<vmem>>, %arg18: memref<1x4xf32, #tpu.memory_space<vmem>>, %arg19: memref<1x16x4xf32, #tpu.memory_space<vmem>>, %arg20: memref<1x16x4xf32, #tpu.memory_space<vmem>>, %arg21: memref<1x16x4xf32, #tpu.memory_space<vmem>>, %arg22: memref<1x16x4xf32, #tpu.memory_space<vmem>>, %arg23: memref<32x32xf32, #tpu.memory_space<vmem>>, %arg24: memref<16x32xf32, #tpu.memory_space<vmem>>) attributes {dimension_semantics = [#tpu.dimension_semantics<parallel>, #tpu.dimension_semantics<arbitrary>], iteration_bounds = array<i64: 2, 3>, scalar_prefetch = 2 : i64, scratch_operands = 2 : i64, tpu.core_type = #tpu.core_type<tc>, window_params = [{transform_indices = @transform_0, window_bounds = array<i64: 1, 16, 6>}, {pipeline_mode = #tpu.pipeline_mode<synchronous>, transform_indices = @transform_1, window_bounds = array<i64: 6, 32>}, {pipeline_mode = #tpu.pipeline_mode<synchronous>, transform_indices = @transform_2, window_bounds = array<i64: 1, 32>}, {transform_indices = @transform_3, window_bounds = array<i64: 1, 1, 1, 32>}, {transform_indices = @transform_4, window_bounds = array<i64: 1, 1, 1, 32>}, {transform_indices = @transform_5, window_bounds = array<i64: 1, 5, 32, 32>}, {transform_indices = @transform_6, window_bounds = array<i64: 1, 5, 32, 32>}, {transform_indices = @transform_7, window_bounds = array<i64: 1, 32, 32>}, {transform_indices = @transform_8, window_bounds = array<i64: 1, 1, 32>}, {transform_indices = @transform_9, window_bounds = array<i64: 1, 32, 32>}, {transform_indices = @transform_10, window_bounds = array<i64: 1, 1, 32>}, {pipeline_mode = #tpu.pipeline_mode<synchronous>, transform_indices = @transform_11, window_bounds = array<i64: 32, 4>}, {pipeline_mode = #tpu.pipeline_mode<synchronous>, transform_indices = @transform_12, window_bounds = array<i64: 32, 4>}, {pipeline_mode = #tpu.pipeline_mode<synchronous>, transform_indices = @transform_13, window_bounds = array<i64: 1, 4>}, {pipeline_mode = #tpu.pipeline_mode<synchronous>, transform_indices = @transform_14, window_bounds = array<i64: 1, 4>}, {transform_indices = @transform_15, window_bounds = array<i64: 1, 16, 4>}, {transform_indices = @transform_16, window_bounds = array<i64: 1, 16, 4>}, {transform_indices = @transform_17, window_bounds = array<i64: 1, 16, 4>}, {transform_indices = @transform_18, window_bounds = array<i64: 1, 16, 4>}]} {
    %0 = arith.index_cast %arg0 : i32 to index
    %1 = memref.load %arg2[%0] : memref<2xi32, #tpu.memory_space<smem>>
    %2 = tpu.iota {dimensions = array<i32: 0>} : vector<16x1xi32>
    %3 = vector.broadcast %1 : i32 to vector<16x1xi32>
    %4 = arith.cmpi slt, %2, %3 : vector<16x1xi32>
    %5 = arith.extui %4 : vector<16x1xi1> to vector<16x1xi32>
    %6 = arith.sitofp %5 : vector<16x1xi32> to vector<16x1xf32>
    %c0_i32 = arith.constant 0 : i32
    %7 = arith.cmpi eq, %arg1, %c0_i32 : i32
    %8 = arith.extui %7 : i1 to i32
    %c0_i32_0 = arith.constant 0 : i32
    %9 = arith.cmpi ne, %8, %c0_i32_0 : i32
    scf.if %9 {
      %cst_77 = arith.constant 0.000000e+00 : f32
      %102 = vector.broadcast %cst_77 : f32 to vector<8x32xf32>
      %c0_78 = arith.constant 0 : index
      %c0_79 = arith.constant 0 : index
      %103 = vector.load %arg23[%c0_78, %c0_79] : memref<32x32xf32, #tpu.memory_space<vmem>>, vector<8x32xf32>
      tpu.vector_store %arg23[%c0_78, %c0_79], %102 {strides = array<i32>} : memref<32x32xf32, #tpu.memory_space<vmem>>, vector<8x32xf32>,
      %c24 = arith.constant 24 : index
      %c0_80 = arith.constant 0 : index
      %104 = vector.load %arg23[%c24, %c0_80] : memref<32x32xf32, #tpu.memory_space<vmem>>, vector<8x32xf32>
      tpu.vector_store %arg23[%c24, %c0_80], %102 {strides = array<i32>} : memref<32x32xf32, #tpu.memory_space<vmem>>, vector<8x32xf32>,
      %c0_81 = arith.constant 0 : index
      %c0_82 = arith.constant 0 : index
      %c0_83 = arith.constant 0 : index
      %105 = vector.load %arg4[%c0_81, %c0_82, %c0_83] : memref<1x16x6xbf16, #tpu.memory_space<vmem>>, vector<1x16x6xbf16>
      %106 = vector.shape_cast %105 : vector<1x16x6xbf16> to vector<16x6xbf16>
      %c0_84 = arith.constant 0 : index
      %c0_85 = arith.constant 0 : index
      %107 = vector.load %arg5[%c0_84, %c0_85] : memref<6x32xbf16, #tpu.memory_space<vmem>>, vector<6x32xbf16>
      %cst_86 = arith.constant dense<0.000000e+00> : vector<16x32xf32>
      %108 = tpu.matmul %106, %107, %cst_86 {dimension_numbers = #tpu.dot_dimension_numbers<[1], [0], [0], [1], [0, 0, 1, 1], [], []>} : vector<16x6xbf16>, vector<6x32xbf16>, vector<16x32xf32> -> vector<16x32xf32>
      %c0_87 = arith.constant 0 : index
      %c0_88 = arith.constant 0 : index
      %109 = vector.load %arg6[%c0_87, %c0_88] : memref<1x32xf32, #tpu.memory_space<vmem>>, vector<1x32xf32>
      %110 = vector.broadcast %109 : vector<1x32xf32> to vector<16x32xf32>
      %111 = arith.addf %108, %110 : vector<16x32xf32>
      %112 = vector.broadcast %6 : vector<16x1xf32> to vector<16x32xf32>
      %113 = arith.mulf %111, %112 : vector<16x32xf32>
      %c8_89 = arith.constant 8 : index
      %c0_90 = arith.constant 0 : index
      %114 = vector.load %arg23[%c8_89, %c0_90] : memref<32x32xf32, #tpu.memory_space<vmem>>, vector<16x32xf32>
      tpu.vector_store %arg23[%c8_89, %c0_90], %113 {strides = array<i32>} : memref<32x32xf32, #tpu.memory_space<vmem>>, vector<16x32xf32>,
      %cst_91 = arith.constant 0.000000e+00 : f32
      %115 = vector.broadcast %cst_91 : f32 to vector<16x32xf32>
      %c0_92 = arith.constant 0 : index
      %c0_93 = arith.constant 0 : index
      %116 = vector.load %arg24[%c0_92, %c0_93] : memref<16x32xf32, #tpu.memory_space<vmem>>, vector<16x32xf32>
      tpu.vector_store %arg24[%c0_92, %c0_93], %115 {strides = array<i32>} : memref<16x32xf32, #tpu.memory_space<vmem>>, vector<16x32xf32>,
    } else {
    }
    %c8 = arith.constant 8 : index
    %c0 = arith.constant 0 : index
    %10 = vector.load %arg23[%c8, %c0] : memref<32x32xf32, #tpu.memory_space<vmem>>, vector<16x32xf32>
    %11 = arith.index_cast %arg1 : i32 to index
    %c0_1 = arith.constant 0 : index
    %12 = memref.load %arg3[%11, %c0_1] : memref<3x5xi32, #tpu.memory_space<smem>>
    %13 = arith.index_cast %12 : i32 to index
    %c0_2 = arith.constant 0 : index
    %14 = vector.load %arg23[%13, %c0_2] : memref<32x32xf32, #tpu.memory_space<vmem>>, vector<16x32xf32>
    %15 = arith.truncf %14 : vector<16x32xf32> to vector<16x32xbf16>
    %c0_3 = arith.constant 0 : index
    %c0_4 = arith.constant 0 : index
    %c0_5 = arith.constant 0 : index
    %c0_6 = arith.constant 0 : index
    %16 = vector.load %arg9[%c0_3, %c0_4, %c0_5, %c0_6] : memref<1x5x32x32xbf16, #tpu.memory_space<vmem>>, vector<1x1x32x32xbf16>
    %17 = vector.shape_cast %16 : vector<1x1x32x32xbf16> to vector<32x32xbf16>
    %cst = arith.constant dense<0.000000e+00> : vector<16x32xf32>
    %18 = tpu.matmul %15, %17, %cst {dimension_numbers = #tpu.dot_dimension_numbers<[1], [0], [0], [1], [0, 0, 1, 1], [], []>} : vector<16x32xbf16>, vector<32x32xbf16>, vector<16x32xf32> -> vector<16x32xf32>
    %c0_7 = arith.constant 0 : index
    %c0_8 = arith.constant 0 : index
    %c0_9 = arith.constant 0 : index
    %c0_10 = arith.constant 0 : index
    %19 = vector.load %arg10[%c0_7, %c0_8, %c0_9, %c0_10] : memref<1x5x32x32xbf16, #tpu.memory_space<vmem>>, vector<1x1x32x32xbf16>
    %20 = vector.shape_cast %19 : vector<1x1x32x32xbf16> to vector<32x32xbf16>
    %cst_11 = arith.constant dense<0.000000e+00> : vector<16x32xf32>
    %21 = tpu.matmul %15, %20, %cst_11 {dimension_numbers = #tpu.dot_dimension_numbers<[1], [0], [0], [1], [0, 0, 1, 1], [], []>} : vector<16x32xbf16>, vector<32x32xbf16>, vector<16x32xf32> -> vector<16x32xf32>
    %22 = arith.index_cast %arg1 : i32 to index
    %c1 = arith.constant 1 : index
    %23 = memref.load %arg3[%22, %c1] : memref<3x5xi32, #tpu.memory_space<smem>>
    %24 = arith.index_cast %23 : i32 to index
    %c0_12 = arith.constant 0 : index
    %25 = vector.load %arg23[%24, %c0_12] : memref<32x32xf32, #tpu.memory_space<vmem>>, vector<16x32xf32>
    %26 = arith.truncf %25 : vector<16x32xf32> to vector<16x32xbf16>
    %c0_13 = arith.constant 0 : index
    %c1_14 = arith.constant 1 : index
    %c0_15 = arith.constant 0 : index
    %c0_16 = arith.constant 0 : index
    %27 = vector.load %arg9[%c0_13, %c1_14, %c0_15, %c0_16] : memref<1x5x32x32xbf16, #tpu.memory_space<vmem>>, vector<1x1x32x32xbf16>
    %28 = vector.shape_cast %27 : vector<1x1x32x32xbf16> to vector<32x32xbf16>
    %cst_17 = arith.constant dense<0.000000e+00> : vector<16x32xf32>
    %29 = tpu.matmul %26, %28, %cst_17 {dimension_numbers = #tpu.dot_dimension_numbers<[1], [0], [0], [1], [0, 0, 1, 1], [], []>} : vector<16x32xbf16>, vector<32x32xbf16>, vector<16x32xf32> -> vector<16x32xf32>
    %30 = arith.addf %18, %29 : vector<16x32xf32>
    %c0_18 = arith.constant 0 : index
    %c1_19 = arith.constant 1 : index
    %c0_20 = arith.constant 0 : index
    %c0_21 = arith.constant 0 : index
    %31 = vector.load %arg10[%c0_18, %c1_19, %c0_20, %c0_21] : memref<1x5x32x32xbf16, #tpu.memory_space<vmem>>, vector<1x1x32x32xbf16>
    %32 = vector.shape_cast %31 : vector<1x1x32x32xbf16> to vector<32x32xbf16>
    %cst_22 = arith.constant dense<0.000000e+00> : vector<16x32xf32>
    %33 = tpu.matmul %26, %32, %cst_22 {dimension_numbers = #tpu.dot_dimension_numbers<[1], [0], [0], [1], [0, 0, 1, 1], [], []>} : vector<16x32xbf16>, vector<32x32xbf16>, vector<16x32xf32> -> vector<16x32xf32>
    %34 = arith.addf %21, %33 : vector<16x32xf32>
    %35 = arith.truncf %10 : vector<16x32xf32> to vector<16x32xbf16>
    %c0_23 = arith.constant 0 : index
    %c2 = arith.constant 2 : index
    %c0_24 = arith.constant 0 : index
    %c0_25 = arith.constant 0 : index
    %36 = vector.load %arg9[%c0_23, %c2, %c0_24, %c0_25] : memref<1x5x32x32xbf16, #tpu.memory_space<vmem>>, vector<1x1x32x32xbf16>
    %37 = vector.shape_cast %36 : vector<1x1x32x32xbf16> to vector<32x32xbf16>
    %cst_26 = arith.constant dense<0.000000e+00> : vector<16x32xf32>
    %38 = tpu.matmul %35, %37, %cst_26 {dimension_numbers = #tpu.dot_dimension_numbers<[1], [0], [0], [1], [0, 0, 1, 1], [], []>} : vector<16x32xbf16>, vector<32x32xbf16>, vector<16x32xf32> -> vector<16x32xf32>
    %39 = arith.addf %30, %38 : vector<16x32xf32>
    %c0_27 = arith.constant 0 : index
    %c2_28 = arith.constant 2 : index
    %c0_29 = arith.constant 0 : index
    %c0_30 = arith.constant 0 : index
    %40 = vector.load %arg10[%c0_27, %c2_28, %c0_29, %c0_30] : memref<1x5x32x32xbf16, #tpu.memory_space<vmem>>, vector<1x1x32x32xbf16>
    %41 = vector.shape_cast %40 : vector<1x1x32x32xbf16> to vector<32x32xbf16>
    %cst_31 = arith.constant dense<0.000000e+00> : vector<16x32xf32>
    %42 = tpu.matmul %35, %41, %cst_31 {dimension_numbers = #tpu.dot_dimension_numbers<[1], [0], [0], [1], [0, 0, 1, 1], [], []>} : vector<16x32xbf16>, vector<32x32xbf16>, vector<16x32xf32> -> vector<16x32xf32>
    %43 = arith.addf %34, %42 : vector<16x32xf32>
    %44 = arith.index_cast %arg1 : i32 to index
    %c3 = arith.constant 3 : index
    %45 = memref.load %arg3[%44, %c3] : memref<3x5xi32, #tpu.memory_space<smem>>
    %46 = arith.index_cast %45 : i32 to index
    %c0_32 = arith.constant 0 : index
    %47 = vector.load %arg23[%46, %c0_32] : memref<32x32xf32, #tpu.memory_space<vmem>>, vector<16x32xf32>
    %48 = arith.truncf %47 : vector<16x32xf32> to vector<16x32xbf16>
    %c0_33 = arith.constant 0 : index
    %c3_34 = arith.constant 3 : index
    %c0_35 = arith.constant 0 : index
    %c0_36 = arith.constant 0 : index
    %49 = vector.load %arg9[%c0_33, %c3_34, %c0_35, %c0_36] : memref<1x5x32x32xbf16, #tpu.memory_space<vmem>>, vector<1x1x32x32xbf16>
    %50 = vector.shape_cast %49 : vector<1x1x32x32xbf16> to vector<32x32xbf16>
    %cst_37 = arith.constant dense<0.000000e+00> : vector<16x32xf32>
    %51 = tpu.matmul %48, %50, %cst_37 {dimension_numbers = #tpu.dot_dimension_numbers<[1], [0], [0], [1], [0, 0, 1, 1], [], []>} : vector<16x32xbf16>, vector<32x32xbf16>, vector<16x32xf32> -> vector<16x32xf32>
    %52 = arith.addf %39, %51 : vector<16x32xf32>
    %c0_38 = arith.constant 0 : index
    %c3_39 = arith.constant 3 : index
    %c0_40 = arith.constant 0 : index
    %c0_41 = arith.constant 0 : index
    %53 = vector.load %arg10[%c0_38, %c3_39, %c0_40, %c0_41] : memref<1x5x32x32xbf16, #tpu.memory_space<vmem>>, vector<1x1x32x32xbf16>
    %54 = vector.shape_cast %53 : vector<1x1x32x32xbf16> to vector<32x32xbf16>
    %cst_42 = arith.constant dense<0.000000e+00> : vector<16x32xf32>
    %55 = tpu.matmul %48, %54, %cst_42 {dimension_numbers = #tpu.dot_dimension_numbers<[1], [0], [0], [1], [0, 0, 1, 1], [], []>} : vector<16x32xbf16>, vector<32x32xbf16>, vector<16x32xf32> -> vector<16x32xf32>
    %56 = arith.addf %43, %55 : vector<16x32xf32>
    %57 = arith.index_cast %arg1 : i32 to index
    %c4 = arith.constant 4 : index
    %58 = memref.load %arg3[%57, %c4] : memref<3x5xi32, #tpu.memory_space<smem>>
    %59 = arith.index_cast %58 : i32 to index
    %c0_43 = arith.constant 0 : index
    %60 = vector.load %arg23[%59, %c0_43] : memref<32x32xf32, #tpu.memory_space<vmem>>, vector<16x32xf32>
    %61 = arith.truncf %60 : vector<16x32xf32> to vector<16x32xbf16>
    %c0_44 = arith.constant 0 : index
    %c4_45 = arith.constant 4 : index
    %c0_46 = arith.constant 0 : index
    %c0_47 = arith.constant 0 : index
    %62 = vector.load %arg9[%c0_44, %c4_45, %c0_46, %c0_47] : memref<1x5x32x32xbf16, #tpu.memory_space<vmem>>, vector<1x1x32x32xbf16>
    %63 = vector.shape_cast %62 : vector<1x1x32x32xbf16> to vector<32x32xbf16>
    %cst_48 = arith.constant dense<0.000000e+00> : vector<16x32xf32>
    %64 = tpu.matmul %61, %63, %cst_48 {dimension_numbers = #tpu.dot_dimension_numbers<[1], [0], [0], [1], [0, 0, 1, 1], [], []>} : vector<16x32xbf16>, vector<32x32xbf16>, vector<16x32xf32> -> vector<16x32xf32>
    %65 = arith.addf %52, %64 : vector<16x32xf32>
    %c0_49 = arith.constant 0 : index
    %c4_50 = arith.constant 4 : index
    %c0_51 = arith.constant 0 : index
    %c0_52 = arith.constant 0 : index
    %66 = vector.load %arg10[%c0_49, %c4_50, %c0_51, %c0_52] : memref<1x5x32x32xbf16, #tpu.memory_space<vmem>>, vector<1x1x32x32xbf16>
    %67 = vector.shape_cast %66 : vector<1x1x32x32xbf16> to vector<32x32xbf16>
    %cst_53 = arith.constant dense<0.000000e+00> : vector<16x32xf32>
    %68 = tpu.matmul %61, %67, %cst_53 {dimension_numbers = #tpu.dot_dimension_numbers<[1], [0], [0], [1], [0, 0, 1, 1], [], []>} : vector<16x32xbf16>, vector<32x32xbf16>, vector<16x32xf32> -> vector<16x32xf32>
    %69 = arith.addf %56, %68 : vector<16x32xf32>
    %c0_54 = arith.constant 0 : index
    %c0_55 = arith.constant 0 : index
    %c0_56 = arith.constant 0 : index
    %c0_57 = arith.constant 0 : index
    %70 = vector.load %arg7[%c0_54, %c0_55, %c0_56, %c0_57] : memref<1x1x1x32xf32, #tpu.memory_space<vmem>>, vector<1x1x1x32xf32>
    %71 = vector.shape_cast %70 : vector<1x1x1x32xf32> to vector<1x32xf32>
    %72 = vector.broadcast %71 : vector<1x32xf32> to vector<16x32xf32>
    %73 = arith.addf %65, %72 : vector<16x32xf32>
    %c0_58 = arith.constant 0 : index
    %c0_59 = arith.constant 0 : index
    %c0_60 = arith.constant 0 : index
    %c0_61 = arith.constant 0 : index
    %74 = vector.load %arg8[%c0_58, %c0_59, %c0_60, %c0_61] : memref<1x1x1x32xf32, #tpu.memory_space<vmem>>, vector<1x1x1x32xf32>
    %75 = vector.shape_cast %74 : vector<1x1x1x32xf32> to vector<1x32xf32>
    %76 = vector.broadcast %75 : vector<1x32xf32> to vector<16x32xf32>
    %77 = arith.addf %69, %76 : vector<16x32xf32>
    %78 = math.tanh %73 : vector<16x32xf32>
    %79 = arith.negf %77 : vector<16x32xf32>
    %80 = math.exp %79 : vector<16x32xf32>
    %cst_62 = arith.constant 1.000000e+00 : f32
    %81 = vector.broadcast %cst_62 : f32 to vector<16x32xf32>
    %82 = arith.addf %81, %80 : vector<16x32xf32>
    %83 = arith.divf %81, %82 : vector<16x32xf32>
    %84 = arith.mulf %78, %83 : vector<16x32xf32>
    %85 = arith.truncf %84 : vector<16x32xf32> to vector<16x32xbf16>
    %c0_63 = arith.constant 0 : index
    %c0_64 = arith.constant 0 : index
    %c0_65 = arith.constant 0 : index
    %86 = vector.load %arg13[%c0_63, %c0_64, %c0_65] : memref<1x32x32xbf16, #tpu.memory_space<vmem>>, vector<1x32x32xbf16>
    %87 = vector.shape_cast %86 : vector<1x32x32xbf16> to vector<32x32xbf16>
    %cst_66 = arith.constant dense<0.000000e+00> : vector<16x32xf32>
    %88 = tpu.matmul %85, %87, %cst_66 {dimension_numbers = #tpu.dot_dimension_numbers<[1], [0], [0], [1], [0, 0, 1, 1], [], []>} : vector<16x32xbf16>, vector<32x32xbf16>, vector<16x32xf32> -> vector<16x32xf32>
    %c0_67 = arith.constant 0 : index
    %c0_68 = arith.constant 0 : index
    %c0_69 = arith.constant 0 : index
    %89 = vector.load %arg14[%c0_67, %c0_68, %c0_69] : memref<1x1x32xf32, #tpu.memory_space<vmem>>, vector<1x1x32xf32>
    %90 = vector.shape_cast %89 : vector<1x1x32xf32> to vector<1x32xf32>
    %91 = vector.broadcast %90 : vector<1x32xf32> to vector<16x32xf32>
    %92 = arith.addf %88, %91 : vector<16x32xf32>
    %c0_70 = arith.constant 0 : index
    %c0_71 = arith.constant 0 : index
    %93 = vector.load %arg24[%c0_70, %c0_71] : memref<16x32xf32, #tpu.memory_space<vmem>>, vector<16x32xf32>
    %94 = arith.addf %93, %92 : vector<16x32xf32>
    %c0_72 = arith.constant 0 : index
    %c0_73 = arith.constant 0 : index
    %95 = vector.load %arg24[%c0_72, %c0_73] : memref<16x32xf32, #tpu.memory_space<vmem>>, vector<16x32xf32>
    tpu.vector_store %arg24[%c0_72, %c0_73], %94 {strides = array<i32>} : memref<16x32xf32, #tpu.memory_space<vmem>>, vector<16x32xf32>,
    %c2_i32 = arith.constant 2 : i32
    %96 = arith.cmpi slt, %arg1, %c2_i32 : i32
    %97 = arith.extui %96 : i1 to i32
    %c0_i32_74 = arith.constant 0 : i32
    %98 = arith.cmpi ne, %97, %c0_i32_74 : i32
    scf.if %98 {
      %c0_77 = arith.constant 0 : index
      %c0_78 = arith.constant 0 : index
      %c0_79 = arith.constant 0 : index
      %102 = vector.load %arg11[%c0_77, %c0_78, %c0_79] : memref<1x32x32xbf16, #tpu.memory_space<vmem>>, vector<1x32x32xbf16>
      %103 = vector.shape_cast %102 : vector<1x32x32xbf16> to vector<32x32xbf16>
      %cst_80 = arith.constant dense<0.000000e+00> : vector<16x32xf32>
      %104 = tpu.matmul %85, %103, %cst_80 {dimension_numbers = #tpu.dot_dimension_numbers<[1], [0], [0], [1], [0, 0, 1, 1], [], []>} : vector<16x32xbf16>, vector<32x32xbf16>, vector<16x32xf32> -> vector<16x32xf32>
      %c0_81 = arith.constant 0 : index
      %c0_82 = arith.constant 0 : index
      %c0_83 = arith.constant 0 : index
      %105 = vector.load %arg12[%c0_81, %c0_82, %c0_83] : memref<1x1x32xf32, #tpu.memory_space<vmem>>, vector<1x1x32xf32>
      %106 = vector.shape_cast %105 : vector<1x1x32xf32> to vector<1x32xf32>
      %107 = vector.broadcast %106 : vector<1x32xf32> to vector<16x32xf32>
      %108 = arith.addf %104, %107 : vector<16x32xf32>
      %109 = arith.addf %10, %108 : vector<16x32xf32>
      %110 = vector.broadcast %6 : vector<16x1xf32> to vector<16x32xf32>
      %111 = arith.mulf %109, %110 : vector<16x32xf32>
      %c8_84 = arith.constant 8 : index
      %c0_85 = arith.constant 0 : index
      %112 = vector.load %arg23[%c8_84, %c0_85] : memref<32x32xf32, #tpu.memory_space<vmem>>, vector<16x32xf32>
      tpu.vector_store %arg23[%c8_84, %c0_85], %111 {strides = array<i32>} : memref<32x32xf32, #tpu.memory_space<vmem>>, vector<16x32xf32>,
    } else {
    }
    %c2_i32_75 = arith.constant 2 : i32
    %99 = arith.cmpi eq, %arg1, %c2_i32_75 : i32
    %100 = arith.extui %99 : i1 to i32
    %c0_i32_76 = arith.constant 0 : i32
    %101 = arith.cmpi ne, %100, %c0_i32_76 : i32
    scf.if %101 {
      %c0_77 = arith.constant 0 : index
      %c0_78 = arith.constant 0 : index
      %102 = vector.load %arg24[%c0_77, %c0_78] : memref<16x32xf32, #tpu.memory_space<vmem>>, vector<16x32xf32>
      %103 = vector.broadcast %6 : vector<16x1xf32> to vector<16x32xf32>
      %104 = arith.mulf %102, %103 : vector<16x32xf32>
      %105 = arith.truncf %104 : vector<16x32xf32> to vector<16x32xbf16>
      %c0_79 = arith.constant 0 : index
      %c0_80 = arith.constant 0 : index
      %106 = vector.load %arg15[%c0_79, %c0_80] : memref<32x4xbf16, #tpu.memory_space<vmem>>, vector<32x4xbf16>
      %cst_81 = arith.constant dense<0.000000e+00> : vector<16x4xf32>
      %107 = tpu.matmul %105, %106, %cst_81 {dimension_numbers = #tpu.dot_dimension_numbers<[1], [0], [0], [1], [0, 0, 1, 1], [], []>} : vector<16x32xbf16>, vector<32x4xbf16>, vector<16x4xf32> -> vector<16x4xf32>
      %c0_82 = arith.constant 0 : index
      %c0_83 = arith.constant 0 : index
      %108 = vector.load %arg17[%c0_82, %c0_83] : memref<1x4xf32, #tpu.memory_space<vmem>>, vector<1x4xf32>
      %109 = vector.broadcast %108 : vector<1x4xf32> to vector<16x4xf32>
      %110 = arith.addf %107, %109 : vector<16x4xf32>
      %c0_84 = arith.constant 0 : index
      %c0_85 = arith.constant 0 : index
      %111 = vector.load %arg16[%c0_84, %c0_85] : memref<32x4xbf16, #tpu.memory_space<vmem>>, vector<32x4xbf16>
      %cst_86 = arith.constant dense<0.000000e+00> : vector<16x4xf32>
      %112 = tpu.matmul %105, %111, %cst_86 {dimension_numbers = #tpu.dot_dimension_numbers<[1], [0], [0], [1], [0, 0, 1, 1], [], []>} : vector<16x32xbf16>, vector<32x4xbf16>, vector<16x4xf32> -> vector<16x4xf32>
      %c0_87 = arith.constant 0 : index
      %c0_88 = arith.constant 0 : index
      %113 = vector.load %arg18[%c0_87, %c0_88] : memref<1x4xf32, #tpu.memory_space<vmem>>, vector<1x4xf32>
      %114 = vector.broadcast %113 : vector<1x4xf32> to vector<16x4xf32>
      %115 = arith.addf %112, %114 : vector<16x4xf32>
      %116 = vector.broadcast %6 : vector<16x1xf32> to vector<16x4xf32>
      %117 = arith.mulf %110, %116 : vector<16x4xf32>
      %118 = vector.broadcast %6 : vector<16x1xf32> to vector<16x4xf32>
      %119 = arith.mulf %115, %118 : vector<16x4xf32>
      %c0_89 = arith.constant 0 : index
      %c0_90 = arith.constant 0 : index
      %c0_91 = arith.constant 0 : index
      %120 = vector.load %arg19[%c0_89, %c0_90, %c0_91] : memref<1x16x4xf32, #tpu.memory_space<vmem>>, vector<1x16x4xf32>
      %121 = vector.shape_cast %120 : vector<1x16x4xf32> to vector<16x4xf32>
      %cst_92 = arith.constant 5.000000e-01 : f32
      %122 = vector.broadcast %cst_92 : f32 to vector<16x4xf32>
      %123 = arith.mulf %121, %122 : vector<16x4xf32>
      %124 = math.exp %119 : vector<16x4xf32>
      %125 = arith.mulf %123, %124 : vector<16x4xf32>
      %126 = arith.addf %117, %125 : vector<16x4xf32>
      %127 = vector.broadcast %6 : vector<16x1xf32> to vector<16x4xf32>
      %128 = arith.mulf %126, %127 : vector<16x4xf32>
      %c0_93 = arith.constant 0 : index
      %c0_94 = arith.constant 0 : index
      %c0_95 = arith.constant 0 : index
      %129 = vector.load %arg20[%c0_93, %c0_94, %c0_95] : memref<1x16x4xf32, #tpu.memory_space<vmem>>, vector<1x16x4xf32>
      %130 = vector.shape_cast %129 : vector<1x16x4xf32> to vector<16x4xf32>
      %131 = vector.shape_cast %128 : vector<16x4xf32> to vector<1x16x4xf32>
      tpu.vector_store %arg20[%c0_93, %c0_94, %c0_95], %131 {strides = array<i32>} : memref<1x16x4xf32, #tpu.memory_space<vmem>>, vector<1x16x4xf32>,
      %c0_96 = arith.constant 0 : index
      %c0_97 = arith.constant 0 : index
      %c0_98 = arith.constant 0 : index
      %132 = vector.load %arg21[%c0_96, %c0_97, %c0_98] : memref<1x16x4xf32, #tpu.memory_space<vmem>>, vector<1x16x4xf32>
      %133 = vector.shape_cast %132 : vector<1x16x4xf32> to vector<16x4xf32>
      %134 = vector.shape_cast %117 : vector<16x4xf32> to vector<1x16x4xf32>
      tpu.vector_store %arg21[%c0_96, %c0_97, %c0_98], %134 {strides = array<i32>} : memref<1x16x4xf32, #tpu.memory_space<vmem>>, vector<1x16x4xf32>,
      %c0_99 = arith.constant 0 : index
      %c0_100 = arith.constant 0 : index
      %c0_101 = arith.constant 0 : index
      %135 = vector.load %arg22[%c0_99, %c0_100, %c0_101] : memref<1x16x4xf32, #tpu.memory_space<vmem>>, vector<1x16x4xf32>
      %136 = vector.shape_cast %135 : vector<1x16x4xf32> to vector<16x4xf32>
      %137 = vector.shape_cast %119 : vector<16x4xf32> to vector<1x16x4xf32>
      tpu.vector_store %arg22[%c0_99, %c0_100, %c0_101], %137 {strides = array<i32>} : memref<1x16x4xf32, #tpu.memory_space<vmem>>, vector<1x16x4xf32>,
    } else {
    }
    return
  }
  func.func @transform_0(%arg0: i32, %arg1: i32, %arg2: memref<2xi32, #tpu.memory_space<smem>>, %arg3: memref<3x5xi32, #tpu.memory_space<smem>>) -> (i32, i32, i32) {
    %c0_i32 = arith.constant 0 : i32
    %c0_i32_0 = arith.constant 0 : i32
    %c0_i32_1 = arith.constant 0 : i32
    return %arg0, %c0_i32, %c0_i32_0 : i32, i32, i32
  }
  func.func @transform_1(%arg0: i32, %arg1: i32, %arg2: memref<2xi32, #tpu.memory_space<smem>>, %arg3: memref<3x5xi32, #tpu.memory_space<smem>>) -> (i32, i32) {
    %c0_i32 = arith.constant 0 : i32
    %c0_i32_0 = arith.constant 0 : i32
    %c0_i32_1 = arith.constant 0 : i32
    return %c0_i32, %c0_i32_0 : i32, i32
  }
  func.func @transform_2(%arg0: i32, %arg1: i32, %arg2: memref<2xi32, #tpu.memory_space<smem>>, %arg3: memref<3x5xi32, #tpu.memory_space<smem>>) -> (i32, i32) {
    %c0_i32 = arith.constant 0 : i32
    %c0_i32_0 = arith.constant 0 : i32
    %c0_i32_1 = arith.constant 0 : i32
    return %c0_i32, %c0_i32_0 : i32, i32
  }
  func.func @transform_3(%arg0: i32, %arg1: i32, %arg2: memref<2xi32, #tpu.memory_space<smem>>, %arg3: memref<3x5xi32, #tpu.memory_space<smem>>) -> (i32, i32, i32, i32) {
    %c0_i32 = arith.constant 0 : i32
    %c0_i32_0 = arith.constant 0 : i32
    %c0_i32_1 = arith.constant 0 : i32
    return %arg0, %arg1, %c0_i32, %c0_i32_0 : i32, i32, i32, i32
  }
  func.func @transform_4(%arg0: i32, %arg1: i32, %arg2: memref<2xi32, #tpu.memory_space<smem>>, %arg3: memref<3x5xi32, #tpu.memory_space<smem>>) -> (i32, i32, i32, i32) {
    %c0_i32 = arith.constant 0 : i32
    %c0_i32_0 = arith.constant 0 : i32
    %c0_i32_1 = arith.constant 0 : i32
    return %arg0, %arg1, %c0_i32, %c0_i32_0 : i32, i32, i32, i32
  }
  func.func @transform_5(%arg0: i32, %arg1: i32, %arg2: memref<2xi32, #tpu.memory_space<smem>>, %arg3: memref<3x5xi32, #tpu.memory_space<smem>>) -> (i32, i32, i32, i32) {
    %c0_i32 = arith.constant 0 : i32
    %c0_i32_0 = arith.constant 0 : i32
    %c0_i32_1 = arith.constant 0 : i32
    %c0_i32_2 = arith.constant 0 : i32
    return %arg1, %c0_i32, %c0_i32_0, %c0_i32_1 : i32, i32, i32, i32
  }
  func.func @transform_6(%arg0: i32, %arg1: i32, %arg2: memref<2xi32, #tpu.memory_space<smem>>, %arg3: memref<3x5xi32, #tpu.memory_space<smem>>) -> (i32, i32, i32, i32) {
    %c0_i32 = arith.constant 0 : i32
    %c0_i32_0 = arith.constant 0 : i32
    %c0_i32_1 = arith.constant 0 : i32
    %c0_i32_2 = arith.constant 0 : i32
    return %arg1, %c0_i32, %c0_i32_0, %c0_i32_1 : i32, i32, i32, i32
  }
  func.func @transform_7(%arg0: i32, %arg1: i32, %arg2: memref<2xi32, #tpu.memory_space<smem>>, %arg3: memref<3x5xi32, #tpu.memory_space<smem>>) -> (i32, i32, i32) {
    %c0_i32 = arith.constant 0 : i32
    %c0_i32_0 = arith.constant 0 : i32
    %c0_i32_1 = arith.constant 0 : i32
    return %arg1, %c0_i32, %c0_i32_0 : i32, i32, i32
  }
  func.func @transform_8(%arg0: i32, %arg1: i32, %arg2: memref<2xi32, #tpu.memory_space<smem>>, %arg3: memref<3x5xi32, #tpu.memory_space<smem>>) -> (i32, i32, i32) {
    %c0_i32 = arith.constant 0 : i32
    %c0_i32_0 = arith.constant 0 : i32
    %c0_i32_1 = arith.constant 0 : i32
    return %arg1, %c0_i32, %c0_i32_0 : i32, i32, i32
  }
  func.func @transform_9(%arg0: i32, %arg1: i32, %arg2: memref<2xi32, #tpu.memory_space<smem>>, %arg3: memref<3x5xi32, #tpu.memory_space<smem>>) -> (i32, i32, i32) {
    %c0_i32 = arith.constant 0 : i32
    %c0_i32_0 = arith.constant 0 : i32
    %c0_i32_1 = arith.constant 0 : i32
    return %arg1, %c0_i32, %c0_i32_0 : i32, i32, i32
  }
  func.func @transform_10(%arg0: i32, %arg1: i32, %arg2: memref<2xi32, #tpu.memory_space<smem>>, %arg3: memref<3x5xi32, #tpu.memory_space<smem>>) -> (i32, i32, i32) {
    %c0_i32 = arith.constant 0 : i32
    %c0_i32_0 = arith.constant 0 : i32
    %c0_i32_1 = arith.constant 0 : i32
    return %arg1, %c0_i32, %c0_i32_0 : i32, i32, i32
  }
  func.func @transform_11(%arg0: i32, %arg1: i32, %arg2: memref<2xi32, #tpu.memory_space<smem>>, %arg3: memref<3x5xi32, #tpu.memory_space<smem>>) -> (i32, i32) {
    %c0_i32 = arith.constant 0 : i32
    %c0_i32_0 = arith.constant 0 : i32
    %c0_i32_1 = arith.constant 0 : i32
    return %c0_i32, %c0_i32_0 : i32, i32
  }
  func.func @transform_12(%arg0: i32, %arg1: i32, %arg2: memref<2xi32, #tpu.memory_space<smem>>, %arg3: memref<3x5xi32, #tpu.memory_space<smem>>) -> (i32, i32) {
    %c0_i32 = arith.constant 0 : i32
    %c0_i32_0 = arith.constant 0 : i32
    %c0_i32_1 = arith.constant 0 : i32
    return %c0_i32, %c0_i32_0 : i32, i32
  }
  func.func @transform_13(%arg0: i32, %arg1: i32, %arg2: memref<2xi32, #tpu.memory_space<smem>>, %arg3: memref<3x5xi32, #tpu.memory_space<smem>>) -> (i32, i32) {
    %c0_i32 = arith.constant 0 : i32
    %c0_i32_0 = arith.constant 0 : i32
    %c0_i32_1 = arith.constant 0 : i32
    return %c0_i32, %c0_i32_0 : i32, i32
  }
  func.func @transform_14(%arg0: i32, %arg1: i32, %arg2: memref<2xi32, #tpu.memory_space<smem>>, %arg3: memref<3x5xi32, #tpu.memory_space<smem>>) -> (i32, i32) {
    %c0_i32 = arith.constant 0 : i32
    %c0_i32_0 = arith.constant 0 : i32
    %c0_i32_1 = arith.constant 0 : i32
    return %c0_i32, %c0_i32_0 : i32, i32
  }
  func.func @transform_15(%arg0: i32, %arg1: i32, %arg2: memref<2xi32, #tpu.memory_space<smem>>, %arg3: memref<3x5xi32, #tpu.memory_space<smem>>) -> (i32, i32, i32) {
    %c0_i32 = arith.constant 0 : i32
    %c0_i32_0 = arith.constant 0 : i32
    %c0_i32_1 = arith.constant 0 : i32
    return %arg0, %c0_i32, %c0_i32_0 : i32, i32, i32
  }
  func.func @transform_16(%arg0: i32, %arg1: i32, %arg2: memref<2xi32, #tpu.memory_space<smem>>, %arg3: memref<3x5xi32, #tpu.memory_space<smem>>) -> (i32, i32, i32) {
    %c0_i32 = arith.constant 0 : i32
    %c0_i32_0 = arith.constant 0 : i32
    %c0_i32_1 = arith.constant 0 : i32
    return %arg0, %c0_i32, %c0_i32_0 : i32, i32, i32
  }
  func.func @transform_17(%arg0: i32, %arg1: i32, %arg2: memref<2xi32, #tpu.memory_space<smem>>, %arg3: memref<3x5xi32, #tpu.memory_space<smem>>) -> (i32, i32, i32) {
    %c0_i32 = arith.constant 0 : i32
    %c0_i32_0 = arith.constant 0 : i32
    %c0_i32_1 = arith.constant 0 : i32
    return %arg0, %c0_i32, %c0_i32_0 : i32, i32, i32
  }
  func.func @transform_18(%arg0: i32, %arg1: i32, %arg2: memref<2xi32, #tpu.memory_space<smem>>, %arg3: memref<3x5xi32, #tpu.memory_space<smem>>) -> (i32, i32, i32) {
    %c0_i32 = arith.constant 0 : i32
    %c0_i32_0 = arith.constant 0 : i32
    %c0_i32_1 = arith.constant 0 : i32
    return %arg0, %c0_i32, %c0_i32_0 : i32, i32, i32
  }
}

</mosaic_0001>

<bundles_post_ra>
// kernel: tpu_custom_call.1
= control target key start
LH: loop header
LB: loop body
LE: loop exit
PB: predicated region body
PF: predicated region fallthrough
CT: control target
= control target key end

     0   :  { %s2356_s26 = smov [#allocation6]   ;;  %s2814_s0 = inlined_call_operand.vmem [shape: s32[2], index: 0, kind: input, shape index: {}]   ;;  %s2815_s2 = inlined_call_operand.vmem [shape: bf16[2,16,6], index: 2, kind: input, shape index: {}]   ;;  %s2816_s3 = inlined_call_operand.vmem [shape: bf16[6,32], index: 3, kind: input, shape index: {}]   ;;  %s2817_s4 = inlined_call_operand.vmem [shape: f32[1,32], index: 4, kind: input, shape index: {}]   ;;  %s2818_s5 = inlined_call_operand.vmem [shape: f32[2,3,1,32], index: 5, kind: input, shape index: {}]   ;;  %s2819_s6 = inlined_call_operand.vmem [shape: f32[2,3,1,32], index: 6, kind: input, shape index: {}]   ;;  %s2820_s7 = inlined_call_operand.hbm [shape: bf16[3,5,32,32], index: 7, kind: input, shape index: {}]   ;;  %s2821_s8 = inlined_call_operand.hbm [shape: bf16[3,5,32,32], index: 8, kind: input, shape index: {}]   ;;  %s2822_s9 = inlined_call_operand.vmem [shape: bf16[3,32,32], index: 9, kind: input, shape index: {}]   ;;  %s2823_s10 = inlined_call_operand.vmem [shape: f32[3,1,32], index: 10, kind: input, shape index: {}]   ;;  %s2824_s11 = inlined_call_operand.hbm [shape: bf16[3,32,32], index: 11, kind: input, shape index: {}]   ;;  %s2825_s12 = inlined_call_operand.vmem [shape: f32[3,1,32], index: 12, kind: input, shape index: {}]   ;;  %s2826_s13 = inlined_call_operand.vmem [shape: bf16[32,4], index: 13, kind: input, shape index: {}]   ;;  %s2827_s14 = inlined_call_operand.vmem [shape: bf16[32,4], index: 14, kind: input, shape index: {}]   ;;  %s2828_s15 = inlined_call_operand.vmem [shape: f32[1,4], index: 15, kind: input, shape index: {}]   ;;  %s2829_s16 = inlined_call_operand.vmem [shape: f32[1,4], index: 16, kind: input, shape index: {}]   ;;  %s2830_s17 = inlined_call_operand.vmem [shape: f32[2,16,4], index: 17, kind: input, shape index: {}]   ;;  %s2831_s18 = inlined_call_operand.vmem [shape: f32[2,16,4], index: 18, kind: output, shape index: {0}]   ;;  %s2832_s19 = inlined_call_operand.vmem [shape: f32[2,16,4], index: 19, kind: output, shape index: {1}]   ;;  %s2833_s20 = inlined_call_operand.vmem [shape: f32[2,16,4], index: 20, kind: output, shape index: {2}]   ;;  %s2834_s1 = inlined_call_operand.vmem [shape: s32[3,5], index: 1, kind: input, shape index: {}]  }
   0x1   :  { %2845 = sst [smem:[#allocation24_spill]] %s2814_s0  ;;  %s32_s25 = sshll.u32 %s2834_s1, 4  ;;  %s33_s25 = int_to_ptr.vmem [resolvable:$true] %s32_s25 }
   0x2   :  { %2846 = sst [smem:[#allocation25_spill]] %s2815_s2 }
   0x3   :  { %2847 = sst [smem:[#allocation26_spill]] %s2816_s3 }
   0x4   :  { %2848 = sst [smem:[#allocation27_spill]] %s2817_s4  ;;  %s2355_s4 = smov [#allocation5]  }
   0x5   :  { %2849 = sst [smem:[#allocation28_spill]] %s2818_s5 }
   0x6   :  { %2850 = sst [smem:[#allocation29_spill]] %s2819_s6 }
   0x7   :  { %2851 = sst [smem:[#allocation30_spill]] %s2820_s7 }
   0x8   :  { %2852 = sst [smem:[#allocation31_spill]] %s2821_s8 }
   0x9   :  { %2853 = sst [smem:[#allocation32_spill]] %s2822_s9 }
   0xa   :  { %2854 = sst [smem:[#allocation33_spill]] %s2823_s10 }
   0xb   :  { %2855 = sst [smem:[#allocation34_spill]] %s2824_s11 }
   0xc   :  { %2856 = sst [smem:[#allocation35_spill]] %s2825_s12 }
   0xd   :  { %2857 = sst [smem:[#allocation36_spill]] %s2826_s13 }
   0xe   :  { %2858 = sst [smem:[#allocation37_spill]] %s2827_s14 }
   0xf   :  { %2859 = sst [smem:[#allocation38_spill]] %s2828_s15 }
  0x10   :  { %2860 = sst [smem:[#allocation39_spill]] %s2829_s16 }
  0x11   :  { %2861 = sst [smem:[#allocation40_spill]] %s2830_s17 }
  0x12   :  { %2862 = sst [smem:[#allocation41_spill]] %s2831_s18 }
  0x13   :  { %2863 = sst [smem:[#allocation42_spill]] %s2832_s19 }
  0x14   :  { %2864 = sst [smem:[#allocation43_spill]] %s2833_s20 }
  0x15   :  { %s2865_s23 = sld [smem:[#allocation24_spill]] }
  0x1b   :  { %s27_s15 = sshll.u32 %s2865_s23, 4  ;;  %s28_s15 = int_to_ptr.vmem [resolvable:$true] %s27_s15 }
  0x1c   :  { %30 = dma.vmem_to_smem %s28_s15, 16, %s2355_s4, [#allocation4] }
  0x1d   :  { %35 = dma.vmem_to_smem %s33_s25, 64, %s2356_s26, [#allocation4] }
  0x1e   :  { %2313 = dma.done.wait [#allocation4], 80 }
  0x1f   :  { %2314 = vsyncadd [#allocation4], 4294967216 }
  0x20   :  { %38 = sfence }
  0x21   :  { %39 = vsyncpa [#allocation8], 0 }
  0x22   :  { %41 = vsyncpa [#allocation8 + $0x1], 0 }
  0x23   :  { %42 = vsyncpa [#allocation10], 0 }
  0x24   :  { %44 = vsyncpa [#allocation10 + $0x1], 0  ;;  %s2472_s27 = smov 0   ;;  %s2474_s28 = smov 0  }
  0x25   :  { %s2476_s5 = smov 0   ;;  %s2478_s1 = smov 0  }
  0x26   :  { %s2480_s29 = smov 0   ;;  %s2482_s15 = smov 0  }
  0x27   :  { %s2484_s30 = smov 0   ;;  %s2486_s0 = smov 0  }
  0x28 LB: > { %2866 = sst [smem:[#allocation15_spill]] %s2329_s28  ;;  %s2836_s21 = sadd.s32 4294967295, %s2353_s0   ;;  %s2353_s0 = sphi %s2486_s0, %s50_s0   ;;  %s2349_s30 = sphi %s2484_s30, %s2913_s30   ;;  %s2345_s15 = sphi %s2482_s15, %s2912_s15   ;;  %s2341_s29 = sphi %s2480_s29, %s2911_s29   ;;  %s2337_s1 = sphi %s2478_s1, %s2910_s1   ;;  %s2333_s5 = sphi %s2476_s5, %s2909_s5   ;;  %s2329_s28 = sphi %s2474_s28, %s2908_s28   ;;  %s2325_s27 = sphi %s2472_s27, %s2907_s27  }
  0x29   : > { %2867 = sst [smem:[#allocation16_spill]] %s2333_s5  ;;  %s59_s2 = sadd.s32 1, %s2345_s15 }
  0x2a   : > { %2868 = sst [smem:[#allocation17_spill]] %s2345_s15  ;;  %p60_p0 = scmp.ge.s32.totalorder %s59_s2, 3 }
  0x2b   : > { %2869 = sst [smem:[#allocation18_spill]] %s2349_s30  ;;  %s62_s22 = sadd.s32 1, %s2349_s30 }
  0x2c   : > { %2870 = sst [smem:[#allocation19_spill]] %s2353_s0  ;;  %s193_s23 = sadd.s32 1, %s2333_s5 }
  0x2d   : > { %p200_p1 = scmp.ne.s32.totalorder %s2333_s5, %s2329_s28  ;;  %s2915_s2 = smov (%p60_p0, %s59_s2), 0 }
  0x2e   : > { %2871 = sst [smem:[#allocation20_spill]] %s2915_s2  ;;  %s2917_s22 = smov (!%p60_p0, %s62_s22), %s2349_s30 }
  0x2f   : > { %s190_s24 = ssub.s32 %s2345_s15, %s2915_s2  ;;  %p201_p2 = scmp.eq.s32.totalorder %s2353_s0, 0 }
  0x30   : > { %p64_p3 = scmp.ge.s32.totalorder %s2917_s22, 2  ;;  %p191_p4 = scmp.eq.s32.totalorder %s190_s24, 0 }
  0x31   : > { %p202_p5 = por %p201_p2, %p200_p1  ;;  %p206_p6 = scmp.ne.s32.totalorder %s2329_s28, %s2325_s27 }
  0x32   : > { %s2919_s22 = smov (%p64_p3, %s2917_s22), 0  ;;  %p207_p7 = scmp.eq.s32.totalorder %s2836_s21, 0 }
  0x33   : > { %2872 = sst [smem:[#allocation21_spill]] %s2919_s22  ;;  %p2073_p8 = scmp.lt.s32.totalorder %s2353_s0, 6 }
  0x34   : > { %s2526_s3 = scalar_select %p191_p4, %s2333_s5, %s193_s23  }
  0x35   : > { %s2532_s25 = sand.u32 1, %s2333_s5   ;;  %p2534_p9 = por %p207_p7, %p206_p6 }
  0x36   : > { %2873 = sst [smem:[#allocation22_spill]] %s2526_s3  ;;  %s2051_s26 = smul.u32 80, %s2532_s25 }
  0x37   : > { %s2052_s24 = smul.u32 80, %s2345_s15  ;;  %p2540_p10 = pnand %p2073_p8, %p202_p5 }
  0x38   : > { %s616_s23 = sand.u32 1, %s2353_s0   ;;  %s2876_s8 = sld [smem:[#allocation31_spill]] }
  0x39   : > { %s620_s30 = scalar_lea.vmem [#allocation9], %s2051_s26  ;;  %p1828_p11 = scmp.ge.s32.totalorder %s2353_s0, 1 }
  0x3a   : > { %s628_s3 = sshll.u32 %s620_s30, 4  ;;  %s617_s16 = scalar_lea.sflag [#allocation10], %s616_s23  ;;  %s629_s3 = int_to_ptr.vmem [resolvable:$true] %s628_s3 }
  0x3b   : > { %s2357_s13 = smov 64   ;;  %s2358_s14 = smov 4  }
  0x3c   : > { %p686_p12 = scmp.lt.s32.totalorder %s2353_s0, 7  ;;  %s2878_s7 = sld [smem:[#allocation30_spill]] }
  0x3d   : > { %s598_s22 = scalar_lea.vmem [#allocation7], %s2051_s26  ;;  %s1825_s23 = sshll.u32 %s2532_s25, 4 }
  0x3e   : > { %s625_s21 = scalar_lea.hbm %s2876_s8, %s2052_s24  ;;  %p2552_p13 = pnand %p1828_p11, %p686_p12 }
  0x3f   : > { %s626_s5 = sshll.u32 %s625_s21, 4  ;;  %s606_s8 = sshll.u32 %s598_s22, 4  ;;  %s627_s5 = int_to_ptr.hbm [resolvable:$true] %s626_s5  ;;  %s607_s8 = int_to_ptr.vmem [resolvable:$true] %s606_s8 }
  0x40   : > { %2069 = dma.hbm_to_vmem [thread:$0]  (!%p2540_p10), %s627_s5, 1280, %s629_s3, %s617_s16, %s2357_s13, %s2357_s13, %s2358_s14  }
  0x41   : > { %s595_s12 = scalar_lea.sflag [#allocation8], %s2532_s25  ;;  %s2015_s5 = sshll.u32 %s2345_s15, 4 }
  0x42   : > { %s603_s21 = scalar_lea.hbm %s2878_s7, %s2052_s24  ;;  %s2879_s11 = sld [smem:[#allocation34_spill]] }
  0x43   : > { %s604_s19 = sshll.u32 %s603_s21, 4  ;;  %s656_s6 = scalar_lea.vmem [#allocation11], %s1825_s23  ;;  %s605_s19 = int_to_ptr.hbm [resolvable:$true] %s604_s19 }
  0x44   : > { %2066 = dma.hbm_to_vmem [thread:$0]  (!%p2540_p10), %s605_s19, 1280, %s607_s8, %s595_s12, %s2357_s13, %s2357_s13, %s2358_s14  }
  0x45   : > { %s664_s18 = sshll.u32 %s656_s6, 4  ;;  %s665_s18 = int_to_ptr.vmem [resolvable:$true] %s664_s18 }
  0x46   : > { %690 = sbr.rel (%p2552_p13) target bundleno = 926 (0x39e), region = 84 }
  0x48   : > { %s661_s9 = scalar_lea.hbm %s2879_s11, %s2015_s5 }
  0x49   : > { %s662_s17 = sshll.u32 %s661_s9, 4  ;;  %s663_s17 = int_to_ptr.hbm [resolvable:$true] %s662_s17 }
  0x4a   : > { %2072 = dma.hbm_to_vmem [thread:$0]  (!%p2540_p10), %s663_s17, 256, %s665_s18, %s617_s16, %s2357_s13, %s2357_s13, %s2358_s14  }
  0x4b   : > { %s2572_s25 = sand.u32 1, %s2329_s28  }
  0x4c   : > { %s2055_s8 = smul.u32 80, %s2572_s25  ;;  %s693_s12 = scalar_lea.sflag [#allocation8], %s2572_s25 }
  0x4e   : > { %s2576_s10 = scalar_lea.vmem [#allocation7], %s2055_s8 }
  0x4f   : > { %2316 = dma.done.wait (%p2534_p9), %s693_s12, 1280  }
  0x50   : > { %2318 = vsyncadd (%p2534_p9), %s693_s12, 4294966016  ;;  %s2880_s6 = sadd.s32 4294967295, %s2353_s0   ;;  %s2584_s14 = scalar_lea.vmem [#allocation9], %s2055_s8 }
  0x51   : > { %s702_s9 = sand.u32 1, %s2880_s6  }
  0x52   : > { %s703_s13 = scalar_lea.sflag [#allocation10], %s702_s9 }
  0x53   : > { %2320 = dma.done.wait (%p2534_p9), %s703_s13, 1536  }
  0x54   : > { %2322 = vsyncadd (%p2534_p9), %s703_s13, 4294965760  ;;  %v877_v0 = vlaneseq  ;;  %p825_p0 = scmp.lt.s32.totalorder %s2341_s29, 1  ;;  %s876_s17 = sld [smem:[#allocation5 + %s2341_s29]]  ;;  %v2359_v4 = vmov 0.0  }
  0x55   : > { %p832_p1 = scmp.lt.s32.totalorder %s2337_s1, 2  ;;  %s2881_s4 = sld [smem:[#allocation25_spill]] }
  0x56   : > { %v878_v1 = vshrl.u32 %v877_v0, 7  ;;  %s2921_s29 = smov (!%p825_p0, %s2341_s29), 1  ;;  %s2882_s22 = sld [smem:[#allocation40_spill]] }
  0x57   : > { %s2016_s18 = sshll.u32 %s2921_s29, 3  ;;  %s2056_s19 = smul.u32 3, %s2921_s29 }
  0x58   : > { %v879_v2 = vadd.s32 8, %v878_v1  ;;  %s2018_s27 = sshll.u32 %s2921_s29, 4  ;;  %s2883_s8 = sld [smem:[#allocation41_spill]] }
  0x59   : > { %s2599_s2 = scalar_select %p832_p1, %s2337_s1, 2 }
  0x5a   : > { %v880_v3 = vstv %s876_s17  ;;  %s2888_s16 = sld [smem:[#allocation33_spill]]  ;;  %p1844_p2 = scmp.ne.s32.totalorder %s2337_s1, 0 }
  0x5b   : > { %s829_s24 = scalar_lea.vmem %s2881_s4, %s2016_s18  ;;  %vm881_vm0 = vcmp.lt.s32.totalorder %v878_v1, %v880_v3  ;;  %vm882_vm1 = vcmp.lt.s32.totalorder %v879_v2, %v880_v3  ;;  %s2612_s29 = sadd.s32 %s2056_s19, %s2599_s2 }
  0x5c   : > { %s2604_s23 = scalar_lea.vmem %s2882_s22, %s2018_s27  ;;  %s2017_s6 = sshll.u32 %s2599_s2, 4  ;;  %v2615_v5 = vsel %vm881_vm0, 1.0, %v2359_v4  ;;  %v2617_v6 = vsel %vm882_vm1, 1.0, %v2359_v4 }
  0x5d   : > { %s2886_s4 = sld [smem:[#allocation29_spill]] }
  0x5e   : > { %s2609_s12 = scalar_lea.vmem %s2883_s8, %s2018_s27  ;;  %s2887_s19 = sld [smem:[#allocation32_spill]] }
  0x5f   : > { %2884 = sst [smem:[#allocation23_spill]] %s2609_s12 }
  0x60   : > { %s851_s7 = scalar_lea.vmem %s2888_s16, %s2599_s2  ;;  %s2889_s28 = sld [smem:[#allocation35_spill]] }
  0x61   : > { %s2890_s13 = sld [smem:[#allocation42_spill]] }
  0x62   : > { %s2893_s11 = sld [smem:[#allocation26_spill]] (!%p1844_p2) }
  0x63   : > { %s843_s30 = scalar_lea.vmem %s2886_s4, %s2612_s29  ;;  %s2891_s4 = sld [smem:[#allocation43_spill]] }
  0x64   : > { %s2630_s5 = scalar_lea.vmem %s2887_s19, %s2017_s6  ;;  %s2892_s6 = sshll.u32 %s2572_s25, 4 }
  0x65   : > { %s2652_s21 = scalar_lea.vmem [#allocation11], %s2892_s6  ;;  %890 = sbr.rel (%p1844_p2) target bundleno = 250 (0xfa), region = 100 }
  0x66   : > { %s854_s0 = scalar_lea.vmem %s2889_s28, %s2599_s2  ;;  %s2894_s25 = sld [smem:[#allocation27_spill]] (!%p1844_p2) }
  0x67   : > { %s2643_s17 = scalar_lea.vmem %s2890_s13, %s2018_s27 }
  0x69   : > { %s2648_s18 = scalar_lea.vmem %s2891_s4, %s2018_s27 }
  0x6a   : > { %v896_v7 = vld [vmem:[%s2893_s11] sm:$0x7]  ;;  %vm910_vm2 = vcmask 1042432   ;;  %vm891_vm3 = vcmask 261120   ;;  %vm906_vm4 = vcmask 48128   ;;  %v2360_v10 = vmov 0.0  }
  0x6b   : > { %v912_v8 = vsel %vm910_vm2, %v896_v7, 0  ;;  %v2022_v9 = vld [vmem:[%s829_s24] sm:$0xff]  ;;  %892 = vst.msk [vmem:[#allocation2] sm:$0xff] %vm891_vm3, %v2360_v10 }
  0x6c   : > { %921 = vmatpush.bf16.msra.mxu0 %v912_v8  ;;  %893 = vst.msk [vmem:[#allocation2 + $0x18] sm:$0xff] %vm891_vm3, %v2360_v10  ;;  %v2144_v11 = vld [vmem:[%s2894_s25] ss:$0 sm:$0xff] }
  0x6d   : > { %932 = vst.msk [vmem:[#allocation3] sm:$0xff] %vm891_vm3, %v2360_v10 }
  0x6e   : > { %933 = vst.msk [vmem:[#allocation3 + $0x8] sm:$0xff] %vm891_vm3, %v2360_v10 }
  0x6f   : > { %1849 = vmatmul.msk.bf16.vlgmr.msra.gmra.mxu0 %vm906_vm4, %v2022_v9 }
  0xec   : > { %v923_v12 = vpop.f32.mrf.mxu0 }
  0xed   : > { %v924_v13 = vadd.f32 %v2144_v11, %v923_v12 }
  0xef   : > { %v928_v14 = vmul.f32 %v2615_v5, %v924_v13 }
  0xf1   : > { %930 = vst.msk [vmem:[#allocation2 + $0x8] sm:$0xff] %vm891_vm3, %v928_v14 }
  0xf4   : > { %v925_v15 = vpop.f32.mrf.mxu0 }
  0xf5   : > { %v926_v16 = vadd.f32 %v2144_v11, %v925_v15 }
  0xf7   : > { %v929_v17 = vmul.f32 %v2617_v6, %v926_v16 }
  0xf9   : > { %931 = vst.msk [vmem:[#allocation2 + $0x10] sm:$0xff] %vm891_vm3, %v929_v17 }
  0xfa PF: > { %v2024_v18 = vld [vmem:[%s2576_s10 + $0x8] sm:$0xff]  ;;  %v2028_v20 = vld [vmem:[%s2576_s10 + $0x18] sm:$0xff]  ;;  %s2673_s24 = sshll.u32 %s2337_s1, 7  ;;  %v2023_v22 = vld [vmem:[%s2576_s10] sm:$0xff]  ;;  %vm973_vm5 = vcmask 261120   ;;  %s2896_s22 = sld [smem:[#allocation28_spill]] }
  0xfb   : > { %v2026_v19 = vld [vmem:[%s2584_s14 + $0x8] sm:$0xff]  ;;  %v2030_v21 = vld [vmem:[%s2584_s14 + $0x18] sm:$0xff]  ;;  %s937_s27 = sld [smem:[#allocation6 + %s2673_s24]]  ;;  %1012 = vmatpush.bf16.msra.mxu1 %v2024_v18  ;;  %v2025_v23 = vld [vmem:[%s2584_s14] sm:$0xff]  ;;  %s950_s12 = sadd.s32 1, %s2673_s24  ;;  %983 = vmatpush.bf16.msra.mxu0 %v2028_v20 }
  0xfc   : > { %1069 = vmatpush.bf16.msra.mxu3 %v2026_v19  ;;  %1043 = vmatpush.bf16.msra.mxu2 %v2030_v21  ;;  %v2027_v24 = vld [vmem:[%s2576_s10 + $0x10] sm:$0xff]  ;;  %s951_s19 = sld [smem:[#allocation6 + %s950_s12]]  ;;  %v2034_v26 = vld [vmem:[%s2584_s14 + $0x28] sm:$0xff]  ;;  %v2038_v27 = vld [vmem:[%s2584_s14 + $0x38] sm:$0xff]  ;;  %s1147_s3 = sadd.s32 3, %s2673_s24 }
  0xfd   : > { %v2029_v25 = vld [vmem:[%s2584_s14 + $0x10] sm:$0xff]  ;;  %v2032_v28 = vld [vmem:[%s2576_s10 + $0x28] sm:$0xff]  ;;  %v2036_v29 = vld [vmem:[%s2576_s10 + $0x38] sm:$0xff]  ;;  %s1148_s9 = sld [smem:[#allocation6 + %s1147_s3]]  ;;  %s1222_s26 = sadd.s32 4, %s2673_s24 }
  0xfe   : > { %v2033_v30 = vld [vmem:[%s2584_s14 + $0x20] sm:$0xff]  ;;  %v2037_v31 = vld [vmem:[%s2584_s14 + $0x30] sm:$0xff]  ;;  %v2042_v40 = vld [vmem:[%s2584_s14 + $0x48] sm:$0xff]  ;;  %s1223_s4 = sld [smem:[#allocation6 + %s1222_s26]]  ;;  %p1984_p3 = scmp.ge.s32.totalorder %s2337_s1, 2 }
  0xff   : > { %1013 = vmatpush.bf16.msra.mxu1 %v2023_v22  ;;  %984 = vmatpush.bf16.msra.mxu0 %v2027_v24  ;;  %v2031_v35 = vld [vmem:[%s2576_s10 + $0x20] sm:$0xff]  ;;  %v2035_v38 = vld [vmem:[%s2576_s10 + $0x30] sm:$0xff]  ;;  %v2040_v41 = vld [vmem:[%s2576_s10 + $0x48] sm:$0xff] }
 0x100   : > { %1070 = vmatpush.bf16.msra.mxu3 %v2025_v23  ;;  %1044 = vmatpush.bf16.msra.mxu2 %v2029_v25  ;;  %v2041_v42 = vld [vmem:[%s2584_s14 + $0x40] sm:$0xff]  ;;  %v2699_v44 = vld [vmem:[#allocation2 + $0x8] sm:$0xff]  ;;  %s2897_s11 = scalar_lea.vmem %s2896_s22, %s2612_s29 }
 0x101   : > { %s938_s8 = scalar_lea.vmem [#allocation2], %s937_s27  ;;  %v2039_v43 = vld [vmem:[%s2576_s10 + $0x40] sm:$0xff]  ;;  %v2044_v16 = vld [vmem:[%s2652_s21 + $0x8] sm:$0xff] }
 0x102   : > { %v939_v32 = vld [vmem:[%s938_s8] sm:$0xff]  ;;  %v940_v33 = vld [vmem:[%s938_s8 + $0x8] sm:$0xff]  ;;  %s952_s13 = scalar_lea.vmem [#allocation2], %s951_s19  ;;  %v2701_v45 = vld [vmem:[#allocation2 + $0x10] sm:$0xff] }
 0x103   : > { %1137 = vmatpush.bf16.msrb.mxu1 %v2034_v26  ;;  %v941_v34 = vpack.c.bf16 %v940_v33, %v939_v32  ;;  %1104 = vmatpush.bf16.msrb.mxu0 %v2032_v28  ;;  %v953_v36 = vld [vmem:[%s952_s13] sm:$0xff]  ;;  %v954_v37 = vld [vmem:[%s952_s13 + $0x8] sm:$0xff]  ;;  %s1149_s20 = scalar_lea.vmem [#allocation2], %s1148_s9  ;;  %v1077_v48 = vpack.c.bf16 %v2701_v45, %v2699_v44 }
 0x104   : > { %1212 = vmatpush.bf16.msrb.mxu3 %v2038_v27  ;;  %1179 = vmatpush.bf16.msrb.mxu2 %v2036_v29  ;;  %v955_v39 = vpack.c.bf16 %v954_v37, %v953_v36  ;;  %v1150_v46 = vld [vmem:[%s1149_s20] sm:$0xff]  ;;  %v1151_v47 = vld [vmem:[%s1149_s20 + $0x8] sm:$0xff]  ;;  %s1224_s10 = scalar_lea.vmem [#allocation2], %s1223_s4 }
 0x105   : > { %1872 = vmatmul.msk.bf16.vlgmr.msra.gmra.mxu1 %vm973_vm5, %v941_v34  ;;  %1894 = vmatmul.msk.bf16.vlgmr.msra.gmra.mxu3 %vm973_vm5, %v941_v34  ;;  %v1152_v49 = vpack.c.bf16 %v1151_v47, %v1150_v46  ;;  %v1225_v50 = vld [vmem:[%s1224_s10] sm:$0xff]  ;;  %v1226_v51 = vld [vmem:[%s1224_s10 + $0x8] sm:$0xff] }
 0x106   : > { %1863 = vmatmul.msk.bf16.vlgmr.msra.gmra.mxu0 %vm973_vm5, %v955_v39  ;;  %1885 = vmatmul.msk.bf16.vlgmr.msra.gmra.mxu2 %vm973_vm5, %v955_v39  ;;  %v1227_v52 = vpack.c.bf16 %v1226_v51, %v1225_v50  ;;  %v2145_v3 = vld [vmem:[%s843_s30] ss:$0 sm:$0xff] }
 0x107   : > { %1138 = vmatpush.bf16.msrb.mxu1 %v2033_v30  ;;  %1105 = vmatpush.bf16.msrb.mxu0 %v2031_v35  ;;  %v2043_v19 = vld [vmem:[%s2652_s21] sm:$0xff] }
 0x108   : > { %1213 = vmatpush.bf16.msrb.mxu3 %v2037_v31  ;;  %1180 = vmatpush.bf16.msrb.mxu2 %v2035_v38 }
 0x10b   : > { %1287 = vmatpush.bf16.msra.mxu1 %v2042_v40  ;;  %1254 = vmatpush.bf16.msra.mxu0 %v2040_v41  ;;  %v2146_v40 = vld [vmem:[%s2897_s11] ss:$0 sm:$0xff] }
 0x10c   : > { %1381 = vmatpush.bf16.msra.mxu2 %v2044_v16 }
 0x10f   : > { %1288 = vmatpush.bf16.msra.mxu1 %v2041_v42  ;;  %1255 = vmatpush.bf16.msra.mxu0 %v2039_v43 }
 0x110   : > { %1382 = vmatpush.bf16.msra.mxu2 %v2043_v19 }
 0x115   : > { %1920 = vmatmul.msk.bf16.vlgmr.msrb.gmra.mxu1 %vm973_vm5, %v1077_v48  ;;  %1946 = vmatmul.msk.bf16.vlgmr.msrb.gmra.mxu3 %vm973_vm5, %v1152_v49 }
 0x116   : > { %1907 = vmatmul.msk.bf16.vlgmr.msrb.gmra.mxu0 %vm973_vm5, %v1077_v48  ;;  %1933 = vmatmul.msk.bf16.vlgmr.msrb.gmra.mxu2 %vm973_vm5, %v1152_v49 }
 0x125   : > { %1972 = vmatmul.msk.bf16.vlgmr.msra.gmra.mxu1 %vm973_vm5, %v1227_v52 }
 0x126   : > { %1959 = vmatmul.msk.bf16.vlgmr.msra.gmra.mxu0 %vm973_vm5, %v1227_v52 }
 0x182   : > { %v1015_v53 = vpop.f32.mrf.mxu1 }
 0x183   : > { %v986_v54 = vpop.f32.mrf.mxu0 }
 0x184   : > { %v1016_v26 = vadd.f32 %v1015_v53, %v986_v54 }
 0x188   : > { %v1072_v55 = vpop.f32.mrf.mxu3 }
 0x189   : > { %v1046_v60 = vpop.f32.mrf.mxu2 }
 0x18a   : > { %v1017_v56 = vpop.f32.mrf.mxu1  ;;  %v1073_v62 = vadd.f32 %v1072_v55, %v1046_v60 }
 0x18b   : > { %v988_v57 = vpop.f32.mrf.mxu0 }
 0x18c   : > { %v1018_v27 = vadd.f32 %v1017_v56, %v988_v57 }
 0x190   : > { %v1074_v58 = vpop.f32.mrf.mxu3 }
 0x191   : > { %v1048_v4 = vpop.f32.mrf.mxu2 }
 0x192   : > { %v1140_v59 = vpop.f32.mrf.mxu1  ;;  %v1075_v9 = vadd.f32 %v1074_v58, %v1048_v4  ;;  %v2147_v4 = vld [vmem:[%s854_s0] ss:$0 sm:$0xff] }
 0x193   : > { %v1107_v63 = vpop.f32.mrf.mxu0  ;;  %v1145_v1 = vadd.f32 %v1140_v59, %v1073_v62 }
 0x194   : > { %v1112_v29 = vadd.f32 %v1107_v63, %v1016_v26 }
 0x198   : > { %v1215_v0 = vpop.f32.mrf.mxu3 }
 0x199   : > { %v1220_v2 = vadd.f32 %v1215_v0, %v1145_v1  ;;  %v1182_v20 = vpop.f32.mrf.mxu2 }
 0x19a   : > { %v1142_v61 = vpop.f32.mrf.mxu1  ;;  %v1187_v34 = vadd.f32 %v1182_v20, %v1112_v29 }
 0x19b   : > { %v1109_v10 = vpop.f32.mrf.mxu0  ;;  %v1146_v13 = vadd.f32 %v1142_v61, %v1075_v9 }
 0x19c   : > { %v1113_v32 = vadd.f32 %v1109_v10, %v1018_v27 }
 0x1a0   : > { %v1217_v12 = vpop.f32.mrf.mxu3 }
 0x1a1   : > { %v1221_v15 = vadd.f32 %v1217_v12, %v1146_v13  ;;  %v1184_v30 = vpop.f32.mrf.mxu2  ;;  %v1390_v12 = vld [vmem:[#allocation3 + $0x8] sm:$0xff] }
 0x1a2   : > { %v1290_v7 = vpop.f32.mrf.mxu1  ;;  %v1188_v37 = vadd.f32 %v1184_v30, %v1113_v32 }
 0x1a3   : > { %v1295_v8 = vadd.f32 %v1290_v7, %v1220_v2  ;;  %v1257_v23 = vpop.f32.mrf.mxu0 }
 0x1a4   : > { %v1262_v39 = vadd.f32 %v1257_v23, %v1187_v34 }
 0x1a5   : > { %v1307_v11 = vadd.f32 %v2145_v3, %v1295_v8  ;;  %v1389_v8 = vld [vmem:[#allocation3] sm:$0xff] }
 0x1a6   : > { %v1301_v43 = vadd.f32 %v2146_v40, %v1262_v39 }
 0x1a7   : > { %v1973_v14 = vmul.f32 -1.442695, %v1307_v11 }
 0x1a9   : > { %2148 = vpow2.f32 %v1973_v14 }
 0x1aa   : > { %v1292_v17 = vpop.f32.mrf.mxu1 }
 0x1ab   : > { %v1296_v18 = vadd.f32 %v1292_v17, %v1221_v15  ;;  %v1259_v36 = vpop.f32.mrf.mxu0 }
 0x1ac   : > { %v1263_v41 = vadd.f32 %v1259_v36, %v1188_v37 }
 0x1ad   : > { %v1308_v21 = vadd.f32 %v2145_v3, %v1296_v18 }
 0x1ae   : > { %v1302_v47 = vadd.f32 %v2146_v40, %v1263_v41 }
 0x1af   : > { %v2149_v22 = vpop.eup %2148  ;;  %v1974_v24 = vmul.f32 -1.442695, %v1308_v21 }
 0x1b0   : > { %v1317_v25 = vadd.f32 1.0, %v2149_v22 }
 0x1b1   : > { %2150 = vpow2.f32 %v1974_v24 }
 0x1b2   : > { %2152 = vrcp.f32 %v1317_v25  ;;  %v1330_v50 = vand.u32 2147483648, %v1317_v25  ;;  %vm1324_vm7 = vweird.f32 %v1317_v25  ;;  %v1328_v51 = vand.u32 2147483647, %v1317_v25 }
 0x1b4   : > { %v1331_v57 = vor.u32 1.1754944e-38, %v1330_v50  ;;  %vm1329_vm10 = vcmp.eq.f32.partialorder %v1328_v51, 8.507059e+37 }
 0x1b7   : > { %v2151_v28 = vpop.eup %2150 }
 0x1b8   : > { %v2153_v31 = vpop.eup %2152  ;;  %v1318_v33 = vadd.f32 1.0, %v2151_v28 }
 0x1b9   : > { %v1320_v35 = vmul.f32 %v2153_v31, %v1317_v25  ;;  %vm1325_vm6 = vweird.f32 %v2153_v31 }
 0x1ba   : > { %2154 = vrcp.f32 %v1318_v33  ;;  %vm1326_vm8 = vmor %vm1324_vm7, %vm1325_vm6  ;;  %v1345_v53 = vand.u32 2147483648, %v1318_v33  ;;  %v1343_v56 = vand.u32 2147483647, %v1318_v33  ;;  %vm1339_vm11 = vweird.f32 %v1318_v33 }
 0x1bb   : > { %v1321_v38 = vsub.f32 1.0, %v1320_v35  ;;  %2156 = vtanh.f32 %v1301_v43 }
 0x1bc   : > { %2158 = vtanh.f32 %v1302_v47  ;;  %v1346_v60 = vor.u32 1.1754944e-38, %v1345_v53  ;;  %vm1344_vm13 = vcmp.eq.f32.partialorder %v1343_v56, 8.507059e+37 }
 0x1bd   : > { %v1322_v42 = vmul.f32 %v2153_v31, %v1321_v38 }
 0x1bf   : > { %v1323_v48 = vadd.f32 %v2153_v31, %v1322_v42 }
 0x1c0   : > { %v2155_v46 = vpop.eup %2154 }
 0x1c1   : > { %v1335_v49 = vmul.f32 %v2155_v46, %v1318_v33  ;;  %v1327_v54 = vsel %vm1326_vm8, %v2153_v31, %v1323_v48  ;;  %vm1340_vm9 = vweird.f32 %v2155_v46  ;;  %v2157_v61 = vpop.eup %2156 }
 0x1c2   : > { %v1332_v59 = vsel %vm1329_vm10, %v1331_v57, %v1327_v54  ;;  %vm1341_vm12 = vmor %vm1339_vm11, %vm1340_vm9  ;;  %v2159_v63 = vpop.eup %2158 }
 0x1c3   : > { %v1336_v52 = vsub.f32 1.0, %v1335_v49  ;;  %v1349_v1 = vmul.f32 %v2157_v61, %v1332_v59 }
 0x1c5   : > { %v1337_v55 = vmul.f32 %v2155_v46, %v1336_v52 }
 0x1c7   : > { %v1338_v58 = vadd.f32 %v2155_v46, %v1337_v55 }
 0x1c9   : > { %v1342_v62 = vsel %vm1341_vm12, %v2155_v46, %v1338_v58 }
 0x1ca   : > { %v1347_v0 = vsel %vm1344_vm13, %v1346_v60, %v1342_v62 }
 0x1cb   : > { %v1350_v2 = vmul.f32 %v2159_v63, %v1347_v0 }
 0x1cd   : > { %v1351_v3 = vpack.c.bf16 %v1350_v2, %v1349_v1 }
 0x1cf   : > { %1983 = vmatmul.msk.bf16.vlgmr.msra.gmra.mxu2 %vm973_vm5, %v1351_v3 }
 0x252   : > { %v1384_v7 = vpop.f32.mrf.mxu2 }
 0x253   : > { %v1385_v9 = vadd.f32 %v2147_v4, %v1384_v7 }
 0x255   : > { %v1391_v10 = vadd.f32 %v1389_v8, %v1385_v9 }
 0x257   : > { %1393 = vst.msk [vmem:[#allocation3] sm:$0xff] %vm973_vm5, %v1391_v10 }
 0x25a   : > { %v1386_v11 = vpop.f32.mrf.mxu2 }
 0x25b   : > { %v1387_v13 = vadd.f32 %v2147_v4, %v1386_v11  ;;  %1398 = sbr.rel (%p1984_p3) target bundleno = 757 (0x2f5), region = 104 }
 0x25d   : > { %v1392_v14 = vadd.f32 %v1390_v12, %v1387_v13 }
 0x25f   : > { %1394 = vst.msk [vmem:[#allocation3 + $0x8] sm:$0xff] %vm973_vm5, %v1392_v14 }
 0x260   : > { %v2046_v15 = vld [vmem:[%s2630_s5 + $0x8] sm:$0xff]  ;;  %v2045_v16 = vld [vmem:[%s2630_s5] sm:$0xff] }
 0x261   : > { %1425 = vmatpush.bf16.msra.mxu0 %v2046_v15  ;;  %v2160_v17 = vld [vmem:[%s851_s7] ss:$0 sm:$0xff] }
 0x265   : > { %1426 = vmatpush.bf16.msra.mxu0 %v2045_v16 }
 0x268   : > { %1993 = vmatmul.msk.bf16.vlgmr.msra.gmra.mxu0 %vm973_vm5, %v1351_v3 }
 0x2e5   : > { %v1428_v18 = vpop.f32.mrf.mxu0 }
 0x2e6   : > { %v1429_v19 = vadd.f32 %v2160_v17, %v1428_v18 }
 0x2e8   : > { %v1433_v20 = vadd.f32 %v1429_v19, %v2699_v44 }
 0x2ea   : > { %v1435_v21 = vmul.f32 %v2615_v5, %v1433_v20 }
 0x2ec   : > { %1437 = vst.msk [vmem:[#allocation2 + $0x8] sm:$0xff] %vm973_vm5, %v1435_v21 }
 0x2ed   : > { %v1430_v22 = vpop.f32.mrf.mxu0 }
 0x2ee   : > { %v1431_v23 = vadd.f32 %v2160_v17, %v1430_v22 }
 0x2f0   : > { %v1434_v24 = vadd.f32 %v1431_v23, %v2701_v45 }
 0x2f2   : > { %v1436_v25 = vmul.f32 %v2617_v6, %v1434_v24 }
 0x2f4   : > { %1438 = vst.msk [vmem:[#allocation2 + $0x10] sm:$0xff] %vm973_vm5, %v1436_v25 }
 0x2f5 PF: > { %p1994_p4 = scmp.ne.s32.totalorder %s2337_s1, 2 }
 0x2f6   : > { %s2900_s5 = sld [smem:[#allocation37_spill]] (!%p1994_p4) }
 0x2f7   : > { %1442 = sbr.rel (%p1994_p4) target bundleno = 926 (0x39e), region = 108  ;;  %s2902_s3 = sld [smem:[#allocation36_spill]] (!%p1994_p4) }
 0x2f8   : > { %s2903_s4 = sld [smem:[#allocation39_spill]] (!%p1994_p4) }
 0x2f9   : > { %s2904_s6 = sld [smem:[#allocation38_spill]] (!%p1994_p4) }
 0x2fa   : > { %s2905_s16 = sld [smem:[#allocation23_spill]] (!%p1994_p4) }
 0x2fc   : > { %s2901_s12 = smov %s2900_s5  ;;  %v2050_v44 = vld [vmem:[%s2900_s5 + $0x8] sm:$0xff]  ;;  %v1443_v27 = vld [vmem:[#allocation3] sm:$0xff]  ;;  %vm1537_vm14 = vcmask 31744  }
 0x2fd   : > { %v2048_v26 = vld [vmem:[%s2902_s3 + $0x8] sm:$0xff]  ;;  %v2049_v45 = vld [vmem:[%s2901_s12] sm:$0xff]  ;;  %1511 = vmatpush.bf16.msra.mxu1 %v2050_v44  ;;  %v1445_v30 = vmul.f32 %v2615_v5, %v1443_v27 }
 0x2fe   : > { %v1444_v28 = vld [vmem:[#allocation3 + $0x8] sm:$0xff]  ;;  %1477 = vmatpush.bf16.msra.mxu0 %v2048_v26  ;;  %v2047_v29 = vld [vmem:[%s2902_s3] sm:$0xff] }
 0x2ff   : > { %v1446_v31 = vmul.f32 %v2617_v6, %v1444_v28  ;;  %v2161_v33 = vld [vmem:[%s2903_s4] ss:$0 sm:$0xff]  ;;  %v1524_v55 = vld [vmem:[%s2604_s23 + $0x8] sm:$0xff] }
 0x300   : > { %v2162_v34 = vld [vmem:[%s2904_s6] ss:$0 sm:$0xff]  ;;  %v1526_v58 = vmul.f32 0.5, %v1524_v55 }
 0x301   : > { %v1447_v32 = vpack.c.bf16 %v1446_v31, %v1445_v30  ;;  %1512 = vmatpush.bf16.msra.mxu1 %v2049_v45  ;;  %v1523_v42 = vld [vmem:[%s2604_s23] sm:$0xff] }
 0x302   : > { %1478 = vmatpush.bf16.msra.mxu0 %v2047_v29  ;;  %v1525_v49 = vmul.f32 0.5, %v1523_v42 }
 0x304   : > { %2012 = vmatmul.msk.bf16.vlgmr.msra.gmra.mxu1 %vm973_vm5, %v1447_v32 }
 0x305   : > { %2003 = vmatmul.msk.bf16.vlgmr.msra.gmra.mxu0 %vm973_vm5, %v1447_v32 }
 0x381   : > { %v1514_v35 = vpop.f32.mrf.mxu1 }
 0x382   : > { %v1480_v36 = vpop.f32.mrf.mxu0  ;;  %v1515_v37 = vadd.f32 %v2161_v33, %v1514_v35 }
 0x383   : > { %v1481_v38 = vadd.f32 %v2162_v34, %v1480_v36 }
 0x384   : > { %v1521_v39 = vmul.f32 %v2615_v5, %v1515_v37 }
 0x385   : > { %v1519_v40 = vmul.f32 %v2615_v5, %v1481_v38 }
 0x386   : > { %v1527_v41 = vmul.f32 1.442695, %v1521_v39  ;;  %1542 = vst.msk [vmem:[%s2648_s18] sm:$0xff] %vm1537_vm14, %v1521_v39 }
 0x387   : > { %1540 = vst.msk [vmem:[%s2643_s17] sm:$0xff] %vm1537_vm14, %v1519_v40 }
 0x388   : > { %2163 = vpow2.f32 %v1527_v41 }
 0x389   : > { %v1516_v43 = vpop.f32.mrf.mxu1 }
 0x38a   : > { %v1482_v46 = vpop.f32.mrf.mxu0  ;;  %v1517_v47 = vadd.f32 %v2161_v33, %v1516_v43 }
 0x38b   : > { %v1483_v48 = vadd.f32 %v2162_v34, %v1482_v46 }
 0x38c   : > { %v1522_v50 = vmul.f32 %v2617_v6, %v1517_v47 }
 0x38d   : > { %v1520_v51 = vmul.f32 %v2617_v6, %v1483_v48 }
 0x38e   : > { %v2164_v52 = vpop.eup %2163  ;;  %v1529_v53 = vmul.f32 1.442695, %v1522_v50  ;;  %1543 = vst.msk [vmem:[%s2648_s18 + $0x8] sm:$0xff] %vm1537_vm14, %v1522_v50 }
 0x38f   : > { %v1531_v54 = vmul.f32 %v2164_v52, %v1525_v49  ;;  %1541 = vst.msk [vmem:[%s2643_s17 + $0x8] sm:$0xff] %vm1537_vm14, %v1520_v51 }
 0x390   : > { %2165 = vpow2.f32 %v1529_v53 }
 0x391   : > { %v1533_v56 = vadd.f32 %v1531_v54, %v1519_v40 }
 0x393   : > { %v1535_v57 = vmul.f32 %v2615_v5, %v1533_v56 }
 0x395   : > { %1538 = vst.msk [vmem:[%s2905_s16] sm:$0xff] %vm1537_vm14, %v1535_v57 }
 0x396   : > { %v2166_v59 = vpop.eup %2165 }
 0x397   : > { %v1532_v60 = vmul.f32 %v2166_v59, %v1526_v58 }
 0x399   : > { %v1534_v61 = vadd.f32 %v1532_v60, %v1520_v51 }
 0x39b   : > { %v1536_v62 = vmul.f32 %v2617_v6, %v1534_v61 }
 0x39d   : > { %1539 = vst.msk [vmem:[%s2905_s16 + $0x8] sm:$0xff] %vm1537_vm14, %v1536_v62 }
 0x39e PF: > { %s2906_s18 = sld [smem:[#allocation19_spill]] }
 0x39f   : > { %s2907_s27 = sld [smem:[#allocation15_spill]] }
 0x3a0   : > { %s2908_s28 = sld [smem:[#allocation16_spill]] }
 0x3a1   : > { %s2909_s5 = sld [smem:[#allocation22_spill]] }
 0x3a2   : > { %s2910_s1 = sld [smem:[#allocation17_spill]] }
 0x3a3   : > { %s2911_s29 = sld [smem:[#allocation18_spill]] }
 0x3a4   : > { %s50_s0 = sadd.s32 1, %s2906_s18   ;;  %s2912_s15 = sld [smem:[#allocation20_spill]] }
 0x3a5   : > { %p47_p5 = scmp.ge.s32.totalorder %s50_s0, 8   ;;  %s2913_s30 = sld [smem:[#allocation21_spill]] }
 0x3a7   :  { %49 = sbr.rel (!%p47_p5) target bundleno = 40 (0x28), region = 217 }
 0x3ac   :  { %1597 = vsyncpa [#allocation8], 1 }
 0x3ad   :  { %1599 = vsyncpa [#allocation8 + $0x1], 1 }
 0x3ae   :  { %1600 = vsyncpa [#allocation10], 1 }
 0x3af   :  { %1602 = vsyncpa [#allocation10 + $0x1], 1 }

</bundles_post_ra>
